<compile_context>
chip_gen: v7x
topology: tpu7x:2x2x1
jax: 0.10.0
libtpu: 0.0.40
codegen_flags: <defaults>
</compile_context>

<pallas_src>
import functools
import math

import jax
import jax.numpy as jnp
from jax import lax
from jax.experimental import pallas as pl
from jax.experimental.pallas import tpu as pltpu


def _round_up(x, m):
    return (x + m - 1) // m * m


# ----------------------------------------------------------------------------
# Fused 3x3 conv (padding=1) Pallas kernel: one image per grid step.
# ----------------------------------------------------------------------------
def _conv3x3_kernel(x_ref, w_ref, b_ref, o_ref, *, stride, oh, ow, relu):
    """x_ref : (HP, SW, WPc, Cin)  bf16  W-parity-split padded input
                 stride==2: SW=2, WPc=W//2+1, plane p holds padded cols p, p+2, ...
                 stride==1: SW=1, WPc=W+2
       w_ref : (9, Cin, Cout)      bf16  tap-major weights (tap k = 3*dy + dx)
       b_ref : (1, Cout)           f32
       o_ref : (OH, OW, Cout)
    """
    cout = w_ref.shape[-1]
    bias = b_ref[...]                                   # (1, Cout) f32, loop-invariant

    def row_body(oy, carry):
        acc = jnp.zeros((ow, cout), jnp.float32)
        for dy in range(3):                             # unrolled: 3 row loads
            rowv = x_ref[stride * oy + dy]              # (SW, WPc, Cin) bf16, dynamic row
            for dx in range(3):                         # unrolled: 9 MXU matmuls / row
                if stride == 2:
                    pw, off = dx % 2, dx // 2
                else:
                    pw, off = 0, dx
                lhs = rowv[pw, off:off + ow, :]         # (OW, Cin), static contiguous slice
                acc = acc + jnp.dot(lhs, w_ref[3 * dy + dx],
                                    preferred_element_type=jnp.float32)
        acc = acc + bias
        if relu:
            acc = jnp.maximum(acc, 0.0)
        o_ref[oy] = acc.astype(o_ref.dtype)             # one lane-dense NHWC output row
        return carry

    lax.fori_loop(0, oh, row_body, 0)


def conv3x3_pallas(x_nhwc, w9, b, *, stride, relu, out_dtype=jnp.bfloat16):
    """x_nhwc: (N,H,W,C); w9: (9,C,Co) tap-major; b: (Co,).  3x3 conv, pad=1."""
    N, H, W, C = x_nhwc.shape
    _, C2, Co = w9.shape
    assert C == C2, (C, C2)
    OH = (H + 2 - 3) // stride + 1
    OW = (W + 2 - 3) // stride + 1

    xp = jnp.pad(x_nhwc.astype(jnp.bfloat16), ((0, 0), (1, 1), (1, 1), (0, 0)))
    if stride == 2:
        # TODO(synk): fused stride-2 path assumes even H, W (true for Procgen / test shapes).
        assert H % 2 == 0 and W % 2 == 0, (H, W)
        SW, WPc = 2, (W + 2) // 2
        # (N,HP,WP,C) -> (N,HP,WPc,2,C) -> (N,HP,2,WPc,C): plane p holds padded cols p, p+2, ...
        xplanes = xp.reshape(N, H + 2, WPc, 2, C).transpose(0, 1, 3, 2, 4)
    else:
        SW, WPc = 1, W + 2
        xplanes = xp.reshape(N, H + 2, 1, WPc, C)
    HP = H + 2

    kernel = functools.partial(_conv3x3_kernel, stride=stride, oh=OH, ow=OW, relu=relu)
    flops = 2 * N * OH * OW * 9 * C * Co
    bytes_accessed = (xplanes.size * 2 + w9.size * 2 + Co * 4
                      + N * OH * OW * Co * jnp.dtype(out_dtype).itemsize)

    return pl.pallas_call(
        kernel,
        out_shape=jax.ShapeDtypeStruct((N, OH, OW, Co), out_dtype),
        grid=(N,),
        in_specs=[
            pl.BlockSpec((None, HP, SW, WPc, C), lambda n: (n, 0, 0, 0, 0)),
            pl.BlockSpec((9, C, Co), lambda n: (0, 0, 0)),       # resident weights
            pl.BlockSpec((1, Co), lambda n: (0, 0)),             # resident bias
        ],
        out_specs=pl.BlockSpec((None, OH, OW, Co), lambda n: (n, 0, 0, 0)),
        compiler_params=pltpu.CompilerParams(
            dimension_semantics=("parallel",),
            vmem_limit_bytes=32 * 1024 * 1024),
        cost_estimate=pl.CostEstimate(
            flops=flops, transcendentals=0, bytes_accessed=bytes_accessed),
    )(xplanes, w9.astype(jnp.bfloat16), b.reshape(1, Co).astype(jnp.float32))


# ----------------------------------------------------------------------------
# Linear: M-tiled fused matmul + bias
# ----------------------------------------------------------------------------
def _linear_kernel(x_ref, w_ref, b_ref, o_ref):
    acc = jnp.dot(x_ref[...], w_ref[...], preferred_element_type=jnp.float32)
    acc = acc + b_ref[...]
    o_ref[...] = acc.astype(o_ref.dtype)


def linear_pallas(x, w, b, *, out_dtype=jnp.float32, max_tm=512):
    M, K = x.shape
    K2, Nf = w.shape
    assert K == K2, (K, K2)
    TM = min(max_tm, _round_up(M, 8))
    Mp = _round_up(M, TM)
    xp = x.astype(jnp.bfloat16)
    if Mp != M:
        xp = jnp.pad(xp, ((0, Mp - M), (0, 0)))

    flops = 2 * Mp * K * Nf
    bytes_accessed = Mp * K * 2 + K * Nf * 2 + Nf * 4 + Mp * Nf * 4
    out = pl.pallas_call(
        _linear_kernel,
        out_shape=jax.ShapeDtypeStruct((Mp, Nf), out_dtype),
        grid=(Mp // TM,),
        in_specs=[
            pl.BlockSpec((TM, K), lambda i: (i, 0)),
            pl.BlockSpec((K, Nf), lambda i: (0, 0)),             # resident weights
            pl.BlockSpec((1, Nf), lambda i: (0, 0)),             # resident bias
        ],
        out_specs=pl.BlockSpec((TM, Nf), lambda i: (i, 0)),
        compiler_params=pltpu.CompilerParams(
            dimension_semantics=("parallel",),
            vmem_limit_bytes=32 * 1024 * 1024),
        cost_estimate=pl.CostEstimate(
            flops=flops, transcendentals=0, bytes_accessed=bytes_accessed),
    )(xp, w.astype(jnp.bfloat16), b.reshape(1, Nf).astype(jnp.float32))
    return out[:M] if Mp != M else out


# ----------------------------------------------------------------------------
# Deterministic orthogonal (gain=0.5) init, mirroring init_orthogonal
# ----------------------------------------------------------------------------
def _orthogonal(key, shape, gain):
    n_rows = shape[0]
    n_cols = int(math.prod(shape[1:]))
    a = jax.random.normal(key, (max(n_rows, n_cols), min(n_rows, n_cols)), jnp.float32)
    q, r = jnp.linalg.qr(a)
    q = q * jnp.sign(jnp.diagonal(r))
    if n_rows < n_cols:
        q = q.T
    return (gain * q[:n_rows, :n_cols]).reshape(shape)


def init_params(key, input_shape, feature_dim, gain=0.5):
    C, H, W = input_shape
    H8, W8 = H // 8, W // 8
    final_conv_size = 64 * W8 * H8
    ks = jax.random.split(key, 5)

    def conv_param(k, ci, co):
        w_oihw = _orthogonal(k, (co, ci, 3, 3), gain)                       # torch (O,I,kh,kw)
        w9 = jnp.transpose(w_oihw, (2, 3, 1, 0)).reshape(9, ci, co)         # (9, Cin, Cout)
        return w9.astype(jnp.bfloat16), jnp.zeros((co,), jnp.float32)

    w1, b1 = conv_param(ks[0], C, 32)
    w2, b2 = conv_param(ks[1], 32, 64)
    w3, b3 = conv_param(ks[2], 64, 64)
    w4, b4 = conv_param(ks[3], 64, 64)

    # torch Linear weight is (feature_dim, final_conv_size); its columns follow
    # torch-Flatten (c,h,w) order.  Permute rows of w5^T once to NHWC (h,w,c)
    # order so the forward pass flattens the NHWC conv output with no transpose.
    w5_t = _orthogonal(ks[4], (feature_dim, final_conv_size), gain).T        # (final, feat)
    w5 = (w5_t.reshape(64, H8, W8, feature_dim)
               .transpose(1, 2, 0, 3)
               .reshape(final_conv_size, feature_dim)).astype(jnp.bfloat16)
    b5 = jnp.zeros((feature_dim,), jnp.float32)
    return dict(w1=w1, b1=b1, w2=w2, b2=b2, w3=w3, b3=b3,
                w4=w4, b4=b4, w5=w5, b5=b5)


# ----------------------------------------------------------------------------
# Forward pass (VICRegEncoderProcgen.forward == ST_DIM_CNN.forward)
# ----------------------------------------------------------------------------
def st_dim_encoder_forward(params, state_nchw, fmaps=False):
    # NCHW -> NHWC; under jit this fuses into conv1's pad/parity-split/bf16 cast.
    x = jnp.transpose(state_nchw, (0, 2, 3, 1))

    h1 = conv3x3_pallas(x,  params["w1"], params["b1"], stride=2, relu=True)   # (N,H/2,W/2,32)
    h2 = conv3x3_pallas(h1, params["w2"], params["b2"], stride=2, relu=True)   # (N,H/4,W/4,64)
    f5 = conv3x3_pallas(h2, params["w3"], params["b3"], stride=2, relu=True)   # (N,H/8,W/8,64)
    h4 = conv3x3_pallas(f5, params["w4"], params["b4"], stride=1, relu=True)   # (N,H/8,W/8,64)

    flat = h4.reshape(h4.shape[0], -1)            # NHWC flatten; w5 rows pre-permuted to match
    out = linear_pallas(flat, params["w5"], params["b5"], out_dtype=jnp.float32)

    if fmaps:
        # torch returns f5.permute(0,2,3,1) == NHWC, which f5 already is here.
        return {"f5": f5.astype(jnp.float32), "out": out}
    return out


def vicreg_encoder_forward(params, state_nchw):
    return st_dim_encoder_forward(params, state_nchw, fmaps=False)


# ----------------------------------------------------------------------------
# Pure-JAX reference with identical numerics (bf16 operands, f32 accumulation)
# ----------------------------------------------------------------------------
def _reference_forward(params, state_nchw):
    def conv_ref(x_bf16, w9, bias, stride):
        ci, co = w9.shape[1], w9.shape[2]
        w = w9.astype(jnp.float32).reshape(3, 3, ci, co)
        y = lax.conv_general_dilated(
            x_bf16.astype(jnp.float32), w,
            window_strides=(stride, stride), padding=((1, 1), (1, 1)),
            dimension_numbers=("NHWC", "HWIO", "NHWC"),
            precision=lax.Precision.HIGHEST)
        return jnp.maximum(y + bias, 0.0).astype(jnp.bfloat16)

    x = jnp.transpose(state_nchw, (0, 2, 3, 1)).astype(jnp.bfloat16)
    h1 = conv_ref(x,  params["w1"], params["b1"], 2)
    h2 = conv_ref(h1, params["w2"], params["b2"], 2)
    f5 = conv_ref(h2, params["w3"], params["b3"], 2)
    h4 = conv_ref(f5, params["w4"], params["b4"], 1)
    flat = h4.reshape(h4.shape[0], -1).astype(jnp.float32)
    return jnp.dot(flat, params["w5"].astype(jnp.float32),
                   precision=lax.Precision.HIGHEST) + params["b5"]


if __name__ == "__main__":
    input_shape = (4, 16, 16)   # (C, H, W)
    feature_dim = 32
    batch = 2

    key = jax.random.PRNGKey(0)
    pkey, xkey = jax.random.split(key)
    params = init_params(pkey, input_shape, feature_dim)
    x = jax.random.normal(xkey, (batch,) + input_shape, jnp.float32)   # NCHW input

    fwd = jax.jit(vicreg_encoder_forward)
    fwd_maps = jax.jit(lambda p, s: st_dim_encoder_forward(p, s, fmaps=True))

    out = jax.block_until_ready(fwd(params, x))
    maps = fwd_maps(params, x)
    jax.block_until_ready(maps["f5"])
    jax.block_until_ready(maps["out"])

    assert out.shape == (batch, feature_dim), out.shape
    assert maps["f5"].shape == (batch, input_shape[1] // 8, input_shape[2] // 8, 64), maps["f5"].shape
    assert maps["out"].shape == (batch, feature_dim), maps["out"].shape

    ref = jax.jit(_reference_forward)(params, x)
    err = float(jnp.max(jnp.abs(out - ref)))
    assert err < 1e-2, f"max |pallas - reference| = {err}"

    print("KERNEL_OK")
</pallas_src>

<mosaic_0001>
module attributes {stable_mosaic.version = 11 : i64} {
  func.func @_conv3x3_kernel(%arg0: i32, %arg1: memref<1x18x2x9x4xbf16, #tpu.memory_space<vmem>>, %arg2: memref<9x4x32xbf16, #tpu.memory_space<vmem>>, %arg3: memref<1x32xf32, #tpu.memory_space<vmem>>, %arg4: memref<1x8x8x32xbf16, #tpu.memory_space<vmem>>) attributes {dimension_semantics = [#tpu.dimension_semantics<parallel>], iteration_bounds = array<i64: 2>, scalar_prefetch = 0 : i64, scratch_operands = 0 : i64, tpu.core_type = #tpu.core_type<tc>, window_params = [{transform_indices = @transform_0, window_bounds = array<i64: 1, 18, 2, 9, 4>}, {pipeline_mode = #tpu.pipeline_mode<synchronous>, transform_indices = @transform_1, window_bounds = array<i64: 9, 4, 32>}, {pipeline_mode = #tpu.pipeline_mode<synchronous>, transform_indices = @transform_2, window_bounds = array<i64: 1, 32>}, {transform_indices = @transform_3, window_bounds = array<i64: 1, 8, 8, 32>}]} {
    %c0 = arith.constant 0 : index
    %c0_0 = arith.constant 0 : index
    %0 = vector.load %arg3[%c0, %c0_0] : memref<1x32xf32, #tpu.memory_space<vmem>>, vector<1x32xf32>
    %c0_i32 = arith.constant 0 : i32
    %c8_i32 = arith.constant 8 : i32
    %1 = arith.addi %c0_i32, %c8_i32 : i32
    %c1_i32 = arith.constant 1 : i32
    scf.for %arg5 = %c0_i32 to %1 step %c1_i32  : i32 {
      %cst = arith.constant 0.000000e+00 : f32
      %2 = vector.broadcast %cst : f32 to vector<8x32xf32>
      %c2_i32 = arith.constant 2 : i32
      %3 = arith.muli %c2_i32, %arg5 : i32
      %c0_i32_2 = arith.constant 0 : i32
      %4 = arith.addi %3, %c0_i32_2 : i32
      %c0_3 = arith.constant 0 : index
      %5 = arith.index_cast %4 : i32 to index
      %c0_4 = arith.constant 0 : index
      %c0_5 = arith.constant 0 : index
      %c0_6 = arith.constant 0 : index
      %6 = vector.load %arg1[%c0_3, %5, %c0_4, %c0_5, %c0_6] : memref<1x18x2x9x4xbf16, #tpu.memory_space<vmem>>, vector<1x1x2x9x4xbf16>
      %7 = vector.shape_cast %6 : vector<1x1x2x9x4xbf16> to vector<2x9x4xbf16>
      %8 = vector.extract_strided_slice %7 {offsets = [0, 0, 0], sizes = [1, 8, 4], strides = [1, 1, 1]} : vector<2x9x4xbf16> to vector<1x8x4xbf16>
      %9 = vector.shape_cast %8 : vector<1x8x4xbf16> to vector<8x4xbf16>
      %c0_7 = arith.constant 0 : index
      %c0_8 = arith.constant 0 : index
      %c0_9 = arith.constant 0 : index
      %10 = vector.load %arg2[%c0_7, %c0_8, %c0_9] : memref<9x4x32xbf16, #tpu.memory_space<vmem>>, vector<1x4x32xbf16>
      %11 = vector.shape_cast %10 : vector<1x4x32xbf16> to vector<4x32xbf16>
      %cst_10 = arith.constant dense<0.000000e+00> : vector<8x32xf32>
      %12 = tpu.matmul %9, %11, %cst_10 {dimension_numbers = #tpu.dot_dimension_numbers<[1], [0], [0], [1], [0, 0, 1, 1], [], []>} : vector<8x4xbf16>, vector<4x32xbf16>, vector<8x32xf32> -> vector<8x32xf32>
      %13 = arith.addf %2, %12 : vector<8x32xf32>
      %14 = vector.extract_strided_slice %7 {offsets = [1, 0, 0], sizes = [1, 8, 4], strides = [1, 1, 1]} : vector<2x9x4xbf16> to vector<1x8x4xbf16>
      %15 = vector.shape_cast %14 : vector<1x8x4xbf16> to vector<8x4xbf16>
      %c1 = arith.constant 1 : index
      %c0_11 = arith.constant 0 : index
      %c0_12 = arith.constant 0 : index
      %16 = vector.load %arg2[%c1, %c0_11, %c0_12] : memref<9x4x32xbf16, #tpu.memory_space<vmem>>, vector<1x4x32xbf16>
      %17 = vector.shape_cast %16 : vector<1x4x32xbf16> to vector<4x32xbf16>
      %cst_13 = arith.constant dense<0.000000e+00> : vector<8x32xf32>
      %18 = tpu.matmul %15, %17, %cst_13 {dimension_numbers = #tpu.dot_dimension_numbers<[1], [0], [0], [1], [0, 0, 1, 1], [], []>} : vector<8x4xbf16>, vector<4x32xbf16>, vector<8x32xf32> -> vector<8x32xf32>
      %19 = arith.addf %13, %18 : vector<8x32xf32>
      %20 = vector.extract_strided_slice %7 {offsets = [0, 1, 0], sizes = [1, 8, 4], strides = [1, 1, 1]} : vector<2x9x4xbf16> to vector<1x8x4xbf16>
      %21 = vector.shape_cast %20 : vector<1x8x4xbf16> to vector<8x4xbf16>
      %c2 = arith.constant 2 : index
      %c0_14 = arith.constant 0 : index
      %c0_15 = arith.constant 0 : index
      %22 = vector.load %arg2[%c2, %c0_14, %c0_15] : memref<9x4x32xbf16, #tpu.memory_space<vmem>>, vector<1x4x32xbf16>
      %23 = vector.shape_cast %22 : vector<1x4x32xbf16> to vector<4x32xbf16>
      %cst_16 = arith.constant dense<0.000000e+00> : vector<8x32xf32>
      %24 = tpu.matmul %21, %23, %cst_16 {dimension_numbers = #tpu.dot_dimension_numbers<[1], [0], [0], [1], [0, 0, 1, 1], [], []>} : vector<8x4xbf16>, vector<4x32xbf16>, vector<8x32xf32> -> vector<8x32xf32>
      %25 = arith.addf %19, %24 : vector<8x32xf32>
      %c2_i32_17 = arith.constant 2 : i32
      %26 = arith.muli %c2_i32_17, %arg5 : i32
      %c1_i32_18 = arith.constant 1 : i32
      %27 = arith.addi %26, %c1_i32_18 : i32
      %c0_19 = arith.constant 0 : index
      %28 = arith.index_cast %27 : i32 to index
      %c0_20 = arith.constant 0 : index
      %c0_21 = arith.constant 0 : index
      %c0_22 = arith.constant 0 : index
      %29 = vector.load %arg1[%c0_19, %28, %c0_20, %c0_21, %c0_22] : memref<1x18x2x9x4xbf16, #tpu.memory_space<vmem>>, vector<1x1x2x9x4xbf16>
      %30 = vector.shape_cast %29 : vector<1x1x2x9x4xbf16> to vector<2x9x4xbf16>
      %31 = vector.extract_strided_slice %30 {offsets = [0, 0, 0], sizes = [1, 8, 4], strides = [1, 1, 1]} : vector<2x9x4xbf16> to vector<1x8x4xbf16>
      %32 = vector.shape_cast %31 : vector<1x8x4xbf16> to vector<8x4xbf16>
      %c3 = arith.constant 3 : index
      %c0_23 = arith.constant 0 : index
      %c0_24 = arith.constant 0 : index
      %33 = vector.load %arg2[%c3, %c0_23, %c0_24] : memref<9x4x32xbf16, #tpu.memory_space<vmem>>, vector<1x4x32xbf16>
      %34 = vector.shape_cast %33 : vector<1x4x32xbf16> to vector<4x32xbf16>
      %cst_25 = arith.constant dense<0.000000e+00> : vector<8x32xf32>
      %35 = tpu.matmul %32, %34, %cst_25 {dimension_numbers = #tpu.dot_dimension_numbers<[1], [0], [0], [1], [0, 0, 1, 1], [], []>} : vector<8x4xbf16>, vector<4x32xbf16>, vector<8x32xf32> -> vector<8x32xf32>
      %36 = arith.addf %25, %35 : vector<8x32xf32>
      %37 = vector.extract_strided_slice %30 {offsets = [1, 0, 0], sizes = [1, 8, 4], strides = [1, 1, 1]} : vector<2x9x4xbf16> to vector<1x8x4xbf16>
      %38 = vector.shape_cast %37 : vector<1x8x4xbf16> to vector<8x4xbf16>
      %c4 = arith.constant 4 : index
      %c0_26 = arith.constant 0 : index
      %c0_27 = arith.constant 0 : index
      %39 = vector.load %arg2[%c4, %c0_26, %c0_27] : memref<9x4x32xbf16, #tpu.memory_space<vmem>>, vector<1x4x32xbf16>
      %40 = vector.shape_cast %39 : vector<1x4x32xbf16> to vector<4x32xbf16>
      %cst_28 = arith.constant dense<0.000000e+00> : vector<8x32xf32>
      %41 = tpu.matmul %38, %40, %cst_28 {dimension_numbers = #tpu.dot_dimension_numbers<[1], [0], [0], [1], [0, 0, 1, 1], [], []>} : vector<8x4xbf16>, vector<4x32xbf16>, vector<8x32xf32> -> vector<8x32xf32>
      %42 = arith.addf %36, %41 : vector<8x32xf32>
      %43 = vector.extract_strided_slice %30 {offsets = [0, 1, 0], sizes = [1, 8, 4], strides = [1, 1, 1]} : vector<2x9x4xbf16> to vector<1x8x4xbf16>
      %44 = vector.shape_cast %43 : vector<1x8x4xbf16> to vector<8x4xbf16>
      %c5 = arith.constant 5 : index
      %c0_29 = arith.constant 0 : index
      %c0_30 = arith.constant 0 : index
      %45 = vector.load %arg2[%c5, %c0_29, %c0_30] : memref<9x4x32xbf16, #tpu.memory_space<vmem>>, vector<1x4x32xbf16>
      %46 = vector.shape_cast %45 : vector<1x4x32xbf16> to vector<4x32xbf16>
      %cst_31 = arith.constant dense<0.000000e+00> : vector<8x32xf32>
      %47 = tpu.matmul %44, %46, %cst_31 {dimension_numbers = #tpu.dot_dimension_numbers<[1], [0], [0], [1], [0, 0, 1, 1], [], []>} : vector<8x4xbf16>, vector<4x32xbf16>, vector<8x32xf32> -> vector<8x32xf32>
      %48 = arith.addf %42, %47 : vector<8x32xf32>
      %c2_i32_32 = arith.constant 2 : i32
      %49 = arith.muli %c2_i32_32, %arg5 : i32
      %c2_i32_33 = arith.constant 2 : i32
      %50 = arith.addi %49, %c2_i32_33 : i32
      %c0_34 = arith.constant 0 : index
      %51 = arith.index_cast %50 : i32 to index
      %c0_35 = arith.constant 0 : index
      %c0_36 = arith.constant 0 : index
      %c0_37 = arith.constant 0 : index
      %52 = vector.load %arg1[%c0_34, %51, %c0_35, %c0_36, %c0_37] : memref<1x18x2x9x4xbf16, #tpu.memory_space<vmem>>, vector<1x1x2x9x4xbf16>
      %53 = vector.shape_cast %52 : vector<1x1x2x9x4xbf16> to vector<2x9x4xbf16>
      %54 = vector.extract_strided_slice %53 {offsets = [0, 0, 0], sizes = [1, 8, 4], strides = [1, 1, 1]} : vector<2x9x4xbf16> to vector<1x8x4xbf16>
      %55 = vector.shape_cast %54 : vector<1x8x4xbf16> to vector<8x4xbf16>
      %c6 = arith.constant 6 : index
      %c0_38 = arith.constant 0 : index
      %c0_39 = arith.constant 0 : index
      %56 = vector.load %arg2[%c6, %c0_38, %c0_39] : memref<9x4x32xbf16, #tpu.memory_space<vmem>>, vector<1x4x32xbf16>
      %57 = vector.shape_cast %56 : vector<1x4x32xbf16> to vector<4x32xbf16>
      %cst_40 = arith.constant dense<0.000000e+00> : vector<8x32xf32>
      %58 = tpu.matmul %55, %57, %cst_40 {dimension_numbers = #tpu.dot_dimension_numbers<[1], [0], [0], [1], [0, 0, 1, 1], [], []>} : vector<8x4xbf16>, vector<4x32xbf16>, vector<8x32xf32> -> vector<8x32xf32>
      %59 = arith.addf %48, %58 : vector<8x32xf32>
      %60 = vector.extract_strided_slice %53 {offsets = [1, 0, 0], sizes = [1, 8, 4], strides = [1, 1, 1]} : vector<2x9x4xbf16> to vector<1x8x4xbf16>
      %61 = vector.shape_cast %60 : vector<1x8x4xbf16> to vector<8x4xbf16>
      %c7 = arith.constant 7 : index
      %c0_41 = arith.constant 0 : index
      %c0_42 = arith.constant 0 : index
      %62 = vector.load %arg2[%c7, %c0_41, %c0_42] : memref<9x4x32xbf16, #tpu.memory_space<vmem>>, vector<1x4x32xbf16>
      %63 = vector.shape_cast %62 : vector<1x4x32xbf16> to vector<4x32xbf16>
      %cst_43 = arith.constant dense<0.000000e+00> : vector<8x32xf32>
      %64 = tpu.matmul %61, %63, %cst_43 {dimension_numbers = #tpu.dot_dimension_numbers<[1], [0], [0], [1], [0, 0, 1, 1], [], []>} : vector<8x4xbf16>, vector<4x32xbf16>, vector<8x32xf32> -> vector<8x32xf32>
      %65 = arith.addf %59, %64 : vector<8x32xf32>
      %66 = vector.extract_strided_slice %53 {offsets = [0, 1, 0], sizes = [1, 8, 4], strides = [1, 1, 1]} : vector<2x9x4xbf16> to vector<1x8x4xbf16>
      %67 = vector.shape_cast %66 : vector<1x8x4xbf16> to vector<8x4xbf16>
      %c8 = arith.constant 8 : index
      %c0_44 = arith.constant 0 : index
      %c0_45 = arith.constant 0 : index
      %68 = vector.load %arg2[%c8, %c0_44, %c0_45] : memref<9x4x32xbf16, #tpu.memory_space<vmem>>, vector<1x4x32xbf16>
      %69 = vector.shape_cast %68 : vector<1x4x32xbf16> to vector<4x32xbf16>
      %cst_46 = arith.constant dense<0.000000e+00> : vector<8x32xf32>
      %70 = tpu.matmul %67, %69, %cst_46 {dimension_numbers = #tpu.dot_dimension_numbers<[1], [0], [0], [1], [0, 0, 1, 1], [], []>} : vector<8x4xbf16>, vector<4x32xbf16>, vector<8x32xf32> -> vector<8x32xf32>
      %71 = arith.addf %65, %70 : vector<8x32xf32>
      %72 = vector.broadcast %0 : vector<1x32xf32> to vector<8x32xf32>
      %73 = arith.addf %71, %72 : vector<8x32xf32>
      %cst_47 = arith.constant 0.000000e+00 : f32
      %74 = vector.broadcast %cst_47 : f32 to vector<8x32xf32>
      %75 = arith.maximumf %73, %74 : vector<8x32xf32>
      %76 = arith.truncf %75 : vector<8x32xf32> to vector<8x32xbf16>
      %c0_48 = arith.constant 0 : index
      %77 = arith.index_cast %arg5 : i32 to index
      %c0_49 = arith.constant 0 : index
      %c0_50 = arith.constant 0 : index
      %78 = vector.load %arg4[%c0_48, %77, %c0_49, %c0_50] : memref<1x8x8x32xbf16, #tpu.memory_space<vmem>>, vector<1x1x8x32xbf16>
      %79 = vector.shape_cast %78 : vector<1x1x8x32xbf16> to vector<8x32xbf16>
      %80 = vector.shape_cast %76 : vector<8x32xbf16> to vector<1x1x8x32xbf16>
      tpu.vector_store %arg4[%c0_48, %77, %c0_49, %c0_50], %80 {strides = array<i32>} : memref<1x8x8x32xbf16, #tpu.memory_space<vmem>>, vector<1x1x8x32xbf16>,
    }
    %c8_i32_1 = arith.constant 8 : i32
    return
  }
  func.func @transform_0(%arg0: i32) -> (i32, i32, i32, i32, i32) {
    %c0_i32 = arith.constant 0 : i32
    %c0_i32_0 = arith.constant 0 : i32
    %c0_i32_1 = arith.constant 0 : i32
    %c0_i32_2 = arith.constant 0 : i32
    %c0_i32_3 = arith.constant 0 : i32
    return %arg0, %c0_i32, %c0_i32_0, %c0_i32_1, %c0_i32_2 : i32, i32, i32, i32, i32
  }
  func.func @transform_1(%arg0: i32) -> (i32, i32, i32) {
    %c0_i32 = arith.constant 0 : i32
    %c0_i32_0 = arith.constant 0 : i32
    %c0_i32_1 = arith.constant 0 : i32
    %c0_i32_2 = arith.constant 0 : i32
    return %c0_i32, %c0_i32_0, %c0_i32_1 : i32, i32, i32
  }
  func.func @transform_2(%arg0: i32) -> (i32, i32) {
    %c0_i32 = arith.constant 0 : i32
    %c0_i32_0 = arith.constant 0 : i32
    %c0_i32_1 = arith.constant 0 : i32
    return %c0_i32, %c0_i32_0 : i32, i32
  }
  func.func @transform_3(%arg0: i32) -> (i32, i32, i32, i32) {
    %c0_i32 = arith.constant 0 : i32
    %c0_i32_0 = arith.constant 0 : i32
    %c0_i32_1 = arith.constant 0 : i32
    %c0_i32_2 = arith.constant 0 : i32
    return %arg0, %c0_i32, %c0_i32_0, %c0_i32_1 : i32, i32, i32, i32
  }
}

module attributes {stable_mosaic.version = 11 : i64} {
  func.func @_conv3x3_kernel(%arg0: i32, %arg1: memref<1x10x2x5x32xbf16, #tpu.memory_space<vmem>>, %arg2: memref<9x32x64xbf16, #tpu.memory_space<vmem>>, %arg3: memref<1x64xf32, #tpu.memory_space<vmem>>, %arg4: memref<1x4x4x64xbf16, #tpu.memory_space<vmem>>) attributes {dimension_semantics = [#tpu.dimension_semantics<parallel>], iteration_bounds = array<i64: 2>, scalar_prefetch = 0 : i64, scratch_operands = 0 : i64, tpu.core_type = #tpu.core_type<tc>, window_params = [{transform_indices = @transform_0, window_bounds = array<i64: 1, 10, 2, 5, 32>}, {pipeline_mode = #tpu.pipeline_mode<synchronous>, transform_indices = @transform_1, window_bounds = array<i64: 9, 32, 64>}, {pipeline_mode = #tpu.pipeline_mode<synchronous>, transform_indices = @transform_2, window_bounds = array<i64: 1, 64>}, {transform_indices = @transform_3, window_bounds = array<i64: 1, 4, 4, 64>}]} {
    %c0 = arith.constant 0 : index
    %c0_0 = arith.constant 0 : index
    %0 = vector.load %arg3[%c0, %c0_0] : memref<1x64xf32, #tpu.memory_space<vmem>>, vector<1x64xf32>
    %c0_i32 = arith.constant 0 : i32
    %c4_i32 = arith.constant 4 : i32
    %1 = arith.addi %c0_i32, %c4_i32 : i32
    %c1_i32 = arith.constant 1 : i32
    scf.for %arg5 = %c0_i32 to %1 step %c1_i32  : i32 {
      %cst = arith.constant 0.000000e+00 : f32
      %2 = vector.broadcast %cst : f32 to vector<4x64xf32>
      %c2_i32 = arith.constant 2 : i32
      %3 = arith.muli %c2_i32, %arg5 : i32
      %c0_i32_2 = arith.constant 0 : i32
      %4 = arith.addi %3, %c0_i32_2 : i32
      %c0_3 = arith.constant 0 : index
      %5 = arith.index_cast %4 : i32 to index
      %c0_4 = arith.constant 0 : index
      %c0_5 = arith.constant 0 : index
      %c0_6 = arith.constant 0 : index
      %6 = vector.load %arg1[%c0_3, %5, %c0_4, %c0_5, %c0_6] : memref<1x10x2x5x32xbf16, #tpu.memory_space<vmem>>, vector<1x1x2x5x32xbf16>
      %7 = vector.shape_cast %6 : vector<1x1x2x5x32xbf16> to vector<2x5x32xbf16>
      %8 = vector.extract_strided_slice %7 {offsets = [0, 0, 0], sizes = [1, 4, 32], strides = [1, 1, 1]} : vector<2x5x32xbf16> to vector<1x4x32xbf16>
      %9 = vector.shape_cast %8 : vector<1x4x32xbf16> to vector<4x32xbf16>
      %c0_7 = arith.constant 0 : index
      %c0_8 = arith.constant 0 : index
      %c0_9 = arith.constant 0 : index
      %10 = vector.load %arg2[%c0_7, %c0_8, %c0_9] : memref<9x32x64xbf16, #tpu.memory_space<vmem>>, vector<1x32x64xbf16>
      %11 = vector.shape_cast %10 : vector<1x32x64xbf16> to vector<32x64xbf16>
      %cst_10 = arith.constant dense<0.000000e+00> : vector<4x64xf32>
      %12 = tpu.matmul %9, %11, %cst_10 {dimension_numbers = #tpu.dot_dimension_numbers<[1], [0], [0], [1], [0, 0, 1, 1], [], []>} : vector<4x32xbf16>, vector<32x64xbf16>, vector<4x64xf32> -> vector<4x64xf32>
      %13 = arith.addf %2, %12 : vector<4x64xf32>
      %14 = vector.extract_strided_slice %7 {offsets = [1, 0, 0], sizes = [1, 4, 32], strides = [1, 1, 1]} : vector<2x5x32xbf16> to vector<1x4x32xbf16>
      %15 = vector.shape_cast %14 : vector<1x4x32xbf16> to vector<4x32xbf16>
      %c1 = arith.constant 1 : index
      %c0_11 = arith.constant 0 : index
      %c0_12 = arith.constant 0 : index
      %16 = vector.load %arg2[%c1, %c0_11, %c0_12] : memref<9x32x64xbf16, #tpu.memory_space<vmem>>, vector<1x32x64xbf16>
      %17 = vector.shape_cast %16 : vector<1x32x64xbf16> to vector<32x64xbf16>
      %cst_13 = arith.constant dense<0.000000e+00> : vector<4x64xf32>
      %18 = tpu.matmul %15, %17, %cst_13 {dimension_numbers = #tpu.dot_dimension_numbers<[1], [0], [0], [1], [0, 0, 1, 1], [], []>} : vector<4x32xbf16>, vector<32x64xbf16>, vector<4x64xf32> -> vector<4x64xf32>
      %19 = arith.addf %13, %18 : vector<4x64xf32>
      %20 = vector.extract_strided_slice %7 {offsets = [0, 1, 0], sizes = [1, 4, 32], strides = [1, 1, 1]} : vector<2x5x32xbf16> to vector<1x4x32xbf16>
      %21 = vector.shape_cast %20 : vector<1x4x32xbf16> to vector<4x32xbf16>
      %c2 = arith.constant 2 : index
      %c0_14 = arith.constant 0 : index
      %c0_15 = arith.constant 0 : index
      %22 = vector.load %arg2[%c2, %c0_14, %c0_15] : memref<9x32x64xbf16, #tpu.memory_space<vmem>>, vector<1x32x64xbf16>
      %23 = vector.shape_cast %22 : vector<1x32x64xbf16> to vector<32x64xbf16>
      %cst_16 = arith.constant dense<0.000000e+00> : vector<4x64xf32>
      %24 = tpu.matmul %21, %23, %cst_16 {dimension_numbers = #tpu.dot_dimension_numbers<[1], [0], [0], [1], [0, 0, 1, 1], [], []>} : vector<4x32xbf16>, vector<32x64xbf16>, vector<4x64xf32> -> vector<4x64xf32>
      %25 = arith.addf %19, %24 : vector<4x64xf32>
      %c2_i32_17 = arith.constant 2 : i32
      %26 = arith.muli %c2_i32_17, %arg5 : i32
      %c1_i32_18 = arith.constant 1 : i32
      %27 = arith.addi %26, %c1_i32_18 : i32
      %c0_19 = arith.constant 0 : index
      %28 = arith.index_cast %27 : i32 to index
      %c0_20 = arith.constant 0 : index
      %c0_21 = arith.constant 0 : index
      %c0_22 = arith.constant 0 : index
      %29 = vector.load %arg1[%c0_19, %28, %c0_20, %c0_21, %c0_22] : memref<1x10x2x5x32xbf16, #tpu.memory_space<vmem>>, vector<1x1x2x5x32xbf16>
      %30 = vector.shape_cast %29 : vector<1x1x2x5x32xbf16> to vector<2x5x32xbf16>
      %31 = vector.extract_strided_slice %30 {offsets = [0, 0, 0], sizes = [1, 4, 32], strides = [1, 1, 1]} : vector<2x5x32xbf16> to vector<1x4x32xbf16>
      %32 = vector.shape_cast %31 : vector<1x4x32xbf16> to vector<4x32xbf16>
      %c3 = arith.constant 3 : index
      %c0_23 = arith.constant 0 : index
      %c0_24 = arith.constant 0 : index
      %33 = vector.load %arg2[%c3, %c0_23, %c0_24] : memref<9x32x64xbf16, #tpu.memory_space<vmem>>, vector<1x32x64xbf16>
      %34 = vector.shape_cast %33 : vector<1x32x64xbf16> to vector<32x64xbf16>
      %cst_25 = arith.constant dense<0.000000e+00> : vector<4x64xf32>
      %35 = tpu.matmul %32, %34, %cst_25 {dimension_numbers = #tpu.dot_dimension_numbers<[1], [0], [0], [1], [0, 0, 1, 1], [], []>} : vector<4x32xbf16>, vector<32x64xbf16>, vector<4x64xf32> -> vector<4x64xf32>
      %36 = arith.addf %25, %35 : vector<4x64xf32>
      %37 = vector.extract_strided_slice %30 {offsets = [1, 0, 0], sizes = [1, 4, 32], strides = [1, 1, 1]} : vector<2x5x32xbf16> to vector<1x4x32xbf16>
      %38 = vector.shape_cast %37 : vector<1x4x32xbf16> to vector<4x32xbf16>
      %c4 = arith.constant 4 : index
      %c0_26 = arith.constant 0 : index
      %c0_27 = arith.constant 0 : index
      %39 = vector.load %arg2[%c4, %c0_26, %c0_27] : memref<9x32x64xbf16, #tpu.memory_space<vmem>>, vector<1x32x64xbf16>
      %40 = vector.shape_cast %39 : vector<1x32x64xbf16> to vector<32x64xbf16>
      %cst_28 = arith.constant dense<0.000000e+00> : vector<4x64xf32>
      %41 = tpu.matmul %38, %40, %cst_28 {dimension_numbers = #tpu.dot_dimension_numbers<[1], [0], [0], [1], [0, 0, 1, 1], [], []>} : vector<4x32xbf16>, vector<32x64xbf16>, vector<4x64xf32> -> vector<4x64xf32>
      %42 = arith.addf %36, %41 : vector<4x64xf32>
      %43 = vector.extract_strided_slice %30 {offsets = [0, 1, 0], sizes = [1, 4, 32], strides = [1, 1, 1]} : vector<2x5x32xbf16> to vector<1x4x32xbf16>
      %44 = vector.shape_cast %43 : vector<1x4x32xbf16> to vector<4x32xbf16>
      %c5 = arith.constant 5 : index
      %c0_29 = arith.constant 0 : index
      %c0_30 = arith.constant 0 : index
      %45 = vector.load %arg2[%c5, %c0_29, %c0_30] : memref<9x32x64xbf16, #tpu.memory_space<vmem>>, vector<1x32x64xbf16>
      %46 = vector.shape_cast %45 : vector<1x32x64xbf16> to vector<32x64xbf16>
      %cst_31 = arith.constant dense<0.000000e+00> : vector<4x64xf32>
      %47 = tpu.matmul %44, %46, %cst_31 {dimension_numbers = #tpu.dot_dimension_numbers<[1], [0], [0], [1], [0, 0, 1, 1], [], []>} : vector<4x32xbf16>, vector<32x64xbf16>, vector<4x64xf32> -> vector<4x64xf32>
      %48 = arith.addf %42, %47 : vector<4x64xf32>
      %c2_i32_32 = arith.constant 2 : i32
      %49 = arith.muli %c2_i32_32, %arg5 : i32
      %c2_i32_33 = arith.constant 2 : i32
      %50 = arith.addi %49, %c2_i32_33 : i32
      %c0_34 = arith.constant 0 : index
      %51 = arith.index_cast %50 : i32 to index
      %c0_35 = arith.constant 0 : index
      %c0_36 = arith.constant 0 : index
      %c0_37 = arith.constant 0 : index
      %52 = vector.load %arg1[%c0_34, %51, %c0_35, %c0_36, %c0_37] : memref<1x10x2x5x32xbf16, #tpu.memory_space<vmem>>, vector<1x1x2x5x32xbf16>
      %53 = vector.shape_cast %52 : vector<1x1x2x5x32xbf16> to vector<2x5x32xbf16>
      %54 = vector.extract_strided_slice %53 {offsets = [0, 0, 0], sizes = [1, 4, 32], strides = [1, 1, 1]} : vector<2x5x32xbf16> to vector<1x4x32xbf16>
      %55 = vector.shape_cast %54 : vector<1x4x32xbf16> to vector<4x32xbf16>
      %c6 = arith.constant 6 : index
      %c0_38 = arith.constant 0 : index
      %c0_39 = arith.constant 0 : index
      %56 = vector.load %arg2[%c6, %c0_38, %c0_39] : memref<9x32x64xbf16, #tpu.memory_space<vmem>>, vector<1x32x64xbf16>
      %57 = vector.shape_cast %56 : vector<1x32x64xbf16> to vector<32x64xbf16>
      %cst_40 = arith.constant dense<0.000000e+00> : vector<4x64xf32>
      %58 = tpu.matmul %55, %57, %cst_40 {dimension_numbers = #tpu.dot_dimension_numbers<[1], [0], [0], [1], [0, 0, 1, 1], [], []>} : vector<4x32xbf16>, vector<32x64xbf16>, vector<4x64xf32> -> vector<4x64xf32>
      %59 = arith.addf %48, %58 : vector<4x64xf32>
      %60 = vector.extract_strided_slice %53 {offsets = [1, 0, 0], sizes = [1, 4, 32], strides = [1, 1, 1]} : vector<2x5x32xbf16> to vector<1x4x32xbf16>
      %61 = vector.shape_cast %60 : vector<1x4x32xbf16> to vector<4x32xbf16>
      %c7 = arith.constant 7 : index
      %c0_41 = arith.constant 0 : index
      %c0_42 = arith.constant 0 : index
      %62 = vector.load %arg2[%c7, %c0_41, %c0_42] : memref<9x32x64xbf16, #tpu.memory_space<vmem>>, vector<1x32x64xbf16>
      %63 = vector.shape_cast %62 : vector<1x32x64xbf16> to vector<32x64xbf16>
      %cst_43 = arith.constant dense<0.000000e+00> : vector<4x64xf32>
      %64 = tpu.matmul %61, %63, %cst_43 {dimension_numbers = #tpu.dot_dimension_numbers<[1], [0], [0], [1], [0, 0, 1, 1], [], []>} : vector<4x32xbf16>, vector<32x64xbf16>, vector<4x64xf32> -> vector<4x64xf32>
      %65 = arith.addf %59, %64 : vector<4x64xf32>
      %66 = vector.extract_strided_slice %53 {offsets = [0, 1, 0], sizes = [1, 4, 32], strides = [1, 1, 1]} : vector<2x5x32xbf16> to vector<1x4x32xbf16>
      %67 = vector.shape_cast %66 : vector<1x4x32xbf16> to vector<4x32xbf16>
      %c8 = arith.constant 8 : index
      %c0_44 = arith.constant 0 : index
      %c0_45 = arith.constant 0 : index
      %68 = vector.load %arg2[%c8, %c0_44, %c0_45] : memref<9x32x64xbf16, #tpu.memory_space<vmem>>, vector<1x32x64xbf16>
      %69 = vector.shape_cast %68 : vector<1x32x64xbf16> to vector<32x64xbf16>
      %cst_46 = arith.constant dense<0.000000e+00> : vector<4x64xf32>
      %70 = tpu.matmul %67, %69, %cst_46 {dimension_numbers = #tpu.dot_dimension_numbers<[1], [0], [0], [1], [0, 0, 1, 1], [], []>} : vector<4x32xbf16>, vector<32x64xbf16>, vector<4x64xf32> -> vector<4x64xf32>
      %71 = arith.addf %65, %70 : vector<4x64xf32>
      %72 = vector.broadcast %0 : vector<1x64xf32> to vector<4x64xf32>
      %73 = arith.addf %71, %72 : vector<4x64xf32>
      %cst_47 = arith.constant 0.000000e+00 : f32
      %74 = vector.broadcast %cst_47 : f32 to vector<4x64xf32>
      %75 = arith.maximumf %73, %74 : vector<4x64xf32>
      %76 = arith.truncf %75 : vector<4x64xf32> to vector<4x64xbf16>
      %c0_48 = arith.constant 0 : index
      %77 = arith.index_cast %arg5 : i32 to index
      %c0_49 = arith.constant 0 : index
      %c0_50 = arith.constant 0 : index
      %78 = vector.load %arg4[%c0_48, %77, %c0_49, %c0_50] : memref<1x4x4x64xbf16, #tpu.memory_space<vmem>>, vector<1x1x4x64xbf16>
      %79 = vector.shape_cast %78 : vector<1x1x4x64xbf16> to vector<4x64xbf16>
      %80 = vector.shape_cast %76 : vector<4x64xbf16> to vector<1x1x4x64xbf16>
      tpu.vector_store %arg4[%c0_48, %77, %c0_49, %c0_50], %80 {strides = array<i32>} : memref<1x4x4x64xbf16, #tpu.memory_space<vmem>>, vector<1x1x4x64xbf16>,
    }
    %c4_i32_1 = arith.constant 4 : i32
    return
  }
  func.func @transform_0(%arg0: i32) -> (i32, i32, i32, i32, i32) {
    %c0_i32 = arith.constant 0 : i32
    %c0_i32_0 = arith.constant 0 : i32
    %c0_i32_1 = arith.constant 0 : i32
    %c0_i32_2 = arith.constant 0 : i32
    %c0_i32_3 = arith.constant 0 : i32
    return %arg0, %c0_i32, %c0_i32_0, %c0_i32_1, %c0_i32_2 : i32, i32, i32, i32, i32
  }
  func.func @transform_1(%arg0: i32) -> (i32, i32, i32) {
    %c0_i32 = arith.constant 0 : i32
    %c0_i32_0 = arith.constant 0 : i32
    %c0_i32_1 = arith.constant 0 : i32
    %c0_i32_2 = arith.constant 0 : i32
    return %c0_i32, %c0_i32_0, %c0_i32_1 : i32, i32, i32
  }
  func.func @transform_2(%arg0: i32) -> (i32, i32) {
    %c0_i32 = arith.constant 0 : i32
    %c0_i32_0 = arith.constant 0 : i32
    %c0_i32_1 = arith.constant 0 : i32
    return %c0_i32, %c0_i32_0 : i32, i32
  }
  func.func @transform_3(%arg0: i32) -> (i32, i32, i32, i32) {
    %c0_i32 = arith.constant 0 : i32
    %c0_i32_0 = arith.constant 0 : i32
    %c0_i32_1 = arith.constant 0 : i32
    %c0_i32_2 = arith.constant 0 : i32
    return %arg0, %c0_i32, %c0_i32_0, %c0_i32_1 : i32, i32, i32, i32
  }
}

module attributes {stable_mosaic.version = 11 : i64} {
  func.func @_conv3x3_kernel(%arg0: i32, %arg1: memref<1x6x2x3x64xbf16, #tpu.memory_space<vmem>>, %arg2: memref<9x64x64xbf16, #tpu.memory_space<vmem>>, %arg3: memref<1x64xf32, #tpu.memory_space<vmem>>, %arg4: memref<1x2x2x64xbf16, #tpu.memory_space<vmem>>) attributes {dimension_semantics = [#tpu.dimension_semantics<parallel>], iteration_bounds = array<i64: 2>, scalar_prefetch = 0 : i64, scratch_operands = 0 : i64, tpu.core_type = #tpu.core_type<tc>, window_params = [{transform_indices = @transform_0, window_bounds = array<i64: 1, 6, 2, 3, 64>}, {pipeline_mode = #tpu.pipeline_mode<synchronous>, transform_indices = @transform_1, window_bounds = array<i64: 9, 64, 64>}, {pipeline_mode = #tpu.pipeline_mode<synchronous>, transform_indices = @transform_2, window_bounds = array<i64: 1, 64>}, {transform_indices = @transform_3, window_bounds = array<i64: 1, 2, 2, 64>}]} {
    %c0 = arith.constant 0 : index
    %c0_0 = arith.constant 0 : index
    %0 = vector.load %arg3[%c0, %c0_0] : memref<1x64xf32, #tpu.memory_space<vmem>>, vector<1x64xf32>
    %c0_i32 = arith.constant 0 : i32
    %c2_i32 = arith.constant 2 : i32
    %1 = arith.addi %c0_i32, %c2_i32 : i32
    %c1_i32 = arith.constant 1 : i32
    scf.for %arg5 = %c0_i32 to %1 step %c1_i32  : i32 {
      %cst = arith.constant 0.000000e+00 : f32
      %2 = vector.broadcast %cst : f32 to vector<2x64xf32>
      %c2_i32_2 = arith.constant 2 : i32
      %3 = arith.muli %c2_i32_2, %arg5 : i32
      %c0_i32_3 = arith.constant 0 : i32
      %4 = arith.addi %3, %c0_i32_3 : i32
      %c0_4 = arith.constant 0 : index
      %5 = arith.index_cast %4 : i32 to index
      %c0_5 = arith.constant 0 : index
      %c0_6 = arith.constant 0 : index
      %c0_7 = arith.constant 0 : index
      %6 = vector.load %arg1[%c0_4, %5, %c0_5, %c0_6, %c0_7] : memref<1x6x2x3x64xbf16, #tpu.memory_space<vmem>>, vector<1x1x2x3x64xbf16>
      %7 = vector.shape_cast %6 : vector<1x1x2x3x64xbf16> to vector<2x3x64xbf16>
      %8 = vector.extract_strided_slice %7 {offsets = [0, 0, 0], sizes = [1, 2, 64], strides = [1, 1, 1]} : vector<2x3x64xbf16> to vector<1x2x64xbf16>
      %9 = vector.shape_cast %8 : vector<1x2x64xbf16> to vector<2x64xbf16>
      %c0_8 = arith.constant 0 : index
      %c0_9 = arith.constant 0 : index
      %c0_10 = arith.constant 0 : index
      %10 = vector.load %arg2[%c0_8, %c0_9, %c0_10] : memref<9x64x64xbf16, #tpu.memory_space<vmem>>, vector<1x64x64xbf16>
      %11 = vector.shape_cast %10 : vector<1x64x64xbf16> to vector<64x64xbf16>
      %cst_11 = arith.constant dense<0.000000e+00> : vector<2x64xf32>
      %12 = tpu.matmul %9, %11, %cst_11 {dimension_numbers = #tpu.dot_dimension_numbers<[1], [0], [0], [1], [0, 0, 1, 1], [], []>} : vector<2x64xbf16>, vector<64x64xbf16>, vector<2x64xf32> -> vector<2x64xf32>
      %13 = arith.addf %2, %12 : vector<2x64xf32>
      %14 = vector.extract_strided_slice %7 {offsets = [1, 0, 0], sizes = [1, 2, 64], strides = [1, 1, 1]} : vector<2x3x64xbf16> to vector<1x2x64xbf16>
      %15 = vector.shape_cast %14 : vector<1x2x64xbf16> to vector<2x64xbf16>
      %c1 = arith.constant 1 : index
      %c0_12 = arith.constant 0 : index
      %c0_13 = arith.constant 0 : index
      %16 = vector.load %arg2[%c1, %c0_12, %c0_13] : memref<9x64x64xbf16, #tpu.memory_space<vmem>>, vector<1x64x64xbf16>
      %17 = vector.shape_cast %16 : vector<1x64x64xbf16> to vector<64x64xbf16>
      %cst_14 = arith.constant dense<0.000000e+00> : vector<2x64xf32>
      %18 = tpu.matmul %15, %17, %cst_14 {dimension_numbers = #tpu.dot_dimension_numbers<[1], [0], [0], [1], [0, 0, 1, 1], [], []>} : vector<2x64xbf16>, vector<64x64xbf16>, vector<2x64xf32> -> vector<2x64xf32>
      %19 = arith.addf %13, %18 : vector<2x64xf32>
      %20 = vector.extract_strided_slice %7 {offsets = [0, 1, 0], sizes = [1, 2, 64], strides = [1, 1, 1]} : vector<2x3x64xbf16> to vector<1x2x64xbf16>
      %21 = vector.shape_cast %20 : vector<1x2x64xbf16> to vector<2x64xbf16>
      %c2 = arith.constant 2 : index
      %c0_15 = arith.constant 0 : index
      %c0_16 = arith.constant 0 : index
      %22 = vector.load %arg2[%c2, %c0_15, %c0_16] : memref<9x64x64xbf16, #tpu.memory_space<vmem>>, vector<1x64x64xbf16>
      %23 = vector.shape_cast %22 : vector<1x64x64xbf16> to vector<64x64xbf16>
      %cst_17 = arith.constant dense<0.000000e+00> : vector<2x64xf32>
      %24 = tpu.matmul %21, %23, %cst_17 {dimension_numbers = #tpu.dot_dimension_numbers<[1], [0], [0], [1], [0, 0, 1, 1], [], []>} : vector<2x64xbf16>, vector<64x64xbf16>, vector<2x64xf32> -> vector<2x64xf32>
      %25 = arith.addf %19, %24 : vector<2x64xf32>
      %c2_i32_18 = arith.constant 2 : i32
      %26 = arith.muli %c2_i32_18, %arg5 : i32
      %c1_i32_19 = arith.constant 1 : i32
      %27 = arith.addi %26, %c1_i32_19 : i32
      %c0_20 = arith.constant 0 : index
      %28 = arith.index_cast %27 : i32 to index
      %c0_21 = arith.constant 0 : index
      %c0_22 = arith.constant 0 : index
      %c0_23 = arith.constant 0 : index
      %29 = vector.load %arg1[%c0_20, %28, %c0_21, %c0_22, %c0_23] : memref<1x6x2x3x64xbf16, #tpu.memory_space<vmem>>, vector<1x1x2x3x64xbf16>
      %30 = vector.shape_cast %29 : vector<1x1x2x3x64xbf16> to vector<2x3x64xbf16>
      %31 = vector.extract_strided_slice %30 {offsets = [0, 0, 0], sizes = [1, 2, 64], strides = [1, 1, 1]} : vector<2x3x64xbf16> to vector<1x2x64xbf16>
      %32 = vector.shape_cast %31 : vector<1x2x64xbf16> to vector<2x64xbf16>
      %c3 = arith.constant 3 : index
      %c0_24 = arith.constant 0 : index
      %c0_25 = arith.constant 0 : index
      %33 = vector.load %arg2[%c3, %c0_24, %c0_25] : memref<9x64x64xbf16, #tpu.memory_space<vmem>>, vector<1x64x64xbf16>
      %34 = vector.shape_cast %33 : vector<1x64x64xbf16> to vector<64x64xbf16>
      %cst_26 = arith.constant dense<0.000000e+00> : vector<2x64xf32>
      %35 = tpu.matmul %32, %34, %cst_26 {dimension_numbers = #tpu.dot_dimension_numbers<[1], [0], [0], [1], [0, 0, 1, 1], [], []>} : vector<2x64xbf16>, vector<64x64xbf16>, vector<2x64xf32> -> vector<2x64xf32>
      %36 = arith.addf %25, %35 : vector<2x64xf32>
      %37 = vector.extract_strided_slice %30 {offsets = [1, 0, 0], sizes = [1, 2, 64], strides = [1, 1, 1]} : vector<2x3x64xbf16> to vector<1x2x64xbf16>
      %38 = vector.shape_cast %37 : vector<1x2x64xbf16> to vector<2x64xbf16>
      %c4 = arith.constant 4 : index
      %c0_27 = arith.constant 0 : index
      %c0_28 = arith.constant 0 : index
      %39 = vector.load %arg2[%c4, %c0_27, %c0_28] : memref<9x64x64xbf16, #tpu.memory_space<vmem>>, vector<1x64x64xbf16>
      %40 = vector.shape_cast %39 : vector<1x64x64xbf16> to vector<64x64xbf16>
      %cst_29 = arith.constant dense<0.000000e+00> : vector<2x64xf32>
      %41 = tpu.matmul %38, %40, %cst_29 {dimension_numbers = #tpu.dot_dimension_numbers<[1], [0], [0], [1], [0, 0, 1, 1], [], []>} : vector<2x64xbf16>, vector<64x64xbf16>, vector<2x64xf32> -> vector<2x64xf32>
      %42 = arith.addf %36, %41 : vector<2x64xf32>
      %43 = vector.extract_strided_slice %30 {offsets = [0, 1, 0], sizes = [1, 2, 64], strides = [1, 1, 1]} : vector<2x3x64xbf16> to vector<1x2x64xbf16>
      %44 = vector.shape_cast %43 : vector<1x2x64xbf16> to vector<2x64xbf16>
      %c5 = arith.constant 5 : index
      %c0_30 = arith.constant 0 : index
      %c0_31 = arith.constant 0 : index
      %45 = vector.load %arg2[%c5, %c0_30, %c0_31] : memref<9x64x64xbf16, #tpu.memory_space<vmem>>, vector<1x64x64xbf16>
      %46 = vector.shape_cast %45 : vector<1x64x64xbf16> to vector<64x64xbf16>
      %cst_32 = arith.constant dense<0.000000e+00> : vector<2x64xf32>
      %47 = tpu.matmul %44, %46, %cst_32 {dimension_numbers = #tpu.dot_dimension_numbers<[1], [0], [0], [1], [0, 0, 1, 1], [], []>} : vector<2x64xbf16>, vector<64x64xbf16>, vector<2x64xf32> -> vector<2x64xf32>
      %48 = arith.addf %42, %47 : vector<2x64xf32>
      %c2_i32_33 = arith.constant 2 : i32
      %49 = arith.muli %c2_i32_33, %arg5 : i32
      %c2_i32_34 = arith.constant 2 : i32
      %50 = arith.addi %49, %c2_i32_34 : i32
      %c0_35 = arith.constant 0 : index
      %51 = arith.index_cast %50 : i32 to index
      %c0_36 = arith.constant 0 : index
      %c0_37 = arith.constant 0 : index
      %c0_38 = arith.constant 0 : index
      %52 = vector.load %arg1[%c0_35, %51, %c0_36, %c0_37, %c0_38] : memref<1x6x2x3x64xbf16, #tpu.memory_space<vmem>>, vector<1x1x2x3x64xbf16>
      %53 = vector.shape_cast %52 : vector<1x1x2x3x64xbf16> to vector<2x3x64xbf16>
      %54 = vector.extract_strided_slice %53 {offsets = [0, 0, 0], sizes = [1, 2, 64], strides = [1, 1, 1]} : vector<2x3x64xbf16> to vector<1x2x64xbf16>
      %55 = vector.shape_cast %54 : vector<1x2x64xbf16> to vector<2x64xbf16>
      %c6 = arith.constant 6 : index
      %c0_39 = arith.constant 0 : index
      %c0_40 = arith.constant 0 : index
      %56 = vector.load %arg2[%c6, %c0_39, %c0_40] : memref<9x64x64xbf16, #tpu.memory_space<vmem>>, vector<1x64x64xbf16>
      %57 = vector.shape_cast %56 : vector<1x64x64xbf16> to vector<64x64xbf16>
      %cst_41 = arith.constant dense<0.000000e+00> : vector<2x64xf32>
      %58 = tpu.matmul %55, %57, %cst_41 {dimension_numbers = #tpu.dot_dimension_numbers<[1], [0], [0], [1], [0, 0, 1, 1], [], []>} : vector<2x64xbf16>, vector<64x64xbf16>, vector<2x64xf32> -> vector<2x64xf32>
      %59 = arith.addf %48, %58 : vector<2x64xf32>
      %60 = vector.extract_strided_slice %53 {offsets = [1, 0, 0], sizes = [1, 2, 64], strides = [1, 1, 1]} : vector<2x3x64xbf16> to vector<1x2x64xbf16>
      %61 = vector.shape_cast %60 : vector<1x2x64xbf16> to vector<2x64xbf16>
      %c7 = arith.constant 7 : index
      %c0_42 = arith.constant 0 : index
      %c0_43 = arith.constant 0 : index
      %62 = vector.load %arg2[%c7, %c0_42, %c0_43] : memref<9x64x64xbf16, #tpu.memory_space<vmem>>, vector<1x64x64xbf16>
      %63 = vector.shape_cast %62 : vector<1x64x64xbf16> to vector<64x64xbf16>
      %cst_44 = arith.constant dense<0.000000e+00> : vector<2x64xf32>
      %64 = tpu.matmul %61, %63, %cst_44 {dimension_numbers = #tpu.dot_dimension_numbers<[1], [0], [0], [1], [0, 0, 1, 1], [], []>} : vector<2x64xbf16>, vector<64x64xbf16>, vector<2x64xf32> -> vector<2x64xf32>
      %65 = arith.addf %59, %64 : vector<2x64xf32>
      %66 = vector.extract_strided_slice %53 {offsets = [0, 1, 0], sizes = [1, 2, 64], strides = [1, 1, 1]} : vector<2x3x64xbf16> to vector<1x2x64xbf16>
      %67 = vector.shape_cast %66 : vector<1x2x64xbf16> to vector<2x64xbf16>
      %c8 = arith.constant 8 : index
      %c0_45 = arith.constant 0 : index
      %c0_46 = arith.constant 0 : index
      %68 = vector.load %arg2[%c8, %c0_45, %c0_46] : memref<9x64x64xbf16, #tpu.memory_space<vmem>>, vector<1x64x64xbf16>
      %69 = vector.shape_cast %68 : vector<1x64x64xbf16> to vector<64x64xbf16>
      %cst_47 = arith.constant dense<0.000000e+00> : vector<2x64xf32>
      %70 = tpu.matmul %67, %69, %cst_47 {dimension_numbers = #tpu.dot_dimension_numbers<[1], [0], [0], [1], [0, 0, 1, 1], [], []>} : vector<2x64xbf16>, vector<64x64xbf16>, vector<2x64xf32> -> vector<2x64xf32>
      %71 = arith.addf %65, %70 : vector<2x64xf32>
      %72 = vector.broadcast %0 : vector<1x64xf32> to vector<2x64xf32>
      %73 = arith.addf %71, %72 : vector<2x64xf32>
      %cst_48 = arith.constant 0.000000e+00 : f32
      %74 = vector.broadcast %cst_48 : f32 to vector<2x64xf32>
      %75 = arith.maximumf %73, %74 : vector<2x64xf32>
      %76 = arith.truncf %75 : vector<2x64xf32> to vector<2x64xbf16>
      %c0_49 = arith.constant 0 : index
      %77 = arith.index_cast %arg5 : i32 to index
      %c0_50 = arith.constant 0 : index
      %c0_51 = arith.constant 0 : index
      %78 = vector.load %arg4[%c0_49, %77, %c0_50, %c0_51] : memref<1x2x2x64xbf16, #tpu.memory_space<vmem>>, vector<1x1x2x64xbf16>
      %79 = vector.shape_cast %78 : vector<1x1x2x64xbf16> to vector<2x64xbf16>
      %80 = vector.shape_cast %76 : vector<2x64xbf16> to vector<1x1x2x64xbf16>
      tpu.vector_store %arg4[%c0_49, %77, %c0_50, %c0_51], %80 {strides = array<i32>} : memref<1x2x2x64xbf16, #tpu.memory_space<vmem>>, vector<1x1x2x64xbf16>,
    }
    %c2_i32_1 = arith.constant 2 : i32
    return
  }
  func.func @transform_0(%arg0: i32) -> (i32, i32, i32, i32, i32) {
    %c0_i32 = arith.constant 0 : i32
    %c0_i32_0 = arith.constant 0 : i32
    %c0_i32_1 = arith.constant 0 : i32
    %c0_i32_2 = arith.constant 0 : i32
    %c0_i32_3 = arith.constant 0 : i32
    return %arg0, %c0_i32, %c0_i32_0, %c0_i32_1, %c0_i32_2 : i32, i32, i32, i32, i32
  }
  func.func @transform_1(%arg0: i32) -> (i32, i32, i32) {
    %c0_i32 = arith.constant 0 : i32
    %c0_i32_0 = arith.constant 0 : i32
    %c0_i32_1 = arith.constant 0 : i32
    %c0_i32_2 = arith.constant 0 : i32
    return %c0_i32, %c0_i32_0, %c0_i32_1 : i32, i32, i32
  }
  func.func @transform_2(%arg0: i32) -> (i32, i32) {
    %c0_i32 = arith.constant 0 : i32
    %c0_i32_0 = arith.constant 0 : i32
    %c0_i32_1 = arith.constant 0 : i32
    return %c0_i32, %c0_i32_0 : i32, i32
  }
  func.func @transform_3(%arg0: i32) -> (i32, i32, i32, i32) {
    %c0_i32 = arith.constant 0 : i32
    %c0_i32_0 = arith.constant 0 : i32
    %c0_i32_1 = arith.constant 0 : i32
    %c0_i32_2 = arith.constant 0 : i32
    return %arg0, %c0_i32, %c0_i32_0, %c0_i32_1 : i32, i32, i32, i32
  }
}

module attributes {stable_mosaic.version = 11 : i64} {
  func.func @_conv3x3_kernel(%arg0: i32, %arg1: memref<1x4x1x4x64xbf16, #tpu.memory_space<vmem>>, %arg2: memref<9x64x64xbf16, #tpu.memory_space<vmem>>, %arg3: memref<1x64xf32, #tpu.memory_space<vmem>>, %arg4: memref<1x2x2x64xbf16, #tpu.memory_space<vmem>>) attributes {dimension_semantics = [#tpu.dimension_semantics<parallel>], iteration_bounds = array<i64: 2>, scalar_prefetch = 0 : i64, scratch_operands = 0 : i64, tpu.core_type = #tpu.core_type<tc>, window_params = [{transform_indices = @transform_0, window_bounds = array<i64: 1, 4, 1, 4, 64>}, {pipeline_mode = #tpu.pipeline_mode<synchronous>, transform_indices = @transform_1, window_bounds = array<i64: 9, 64, 64>}, {pipeline_mode = #tpu.pipeline_mode<synchronous>, transform_indices = @transform_2, window_bounds = array<i64: 1, 64>}, {transform_indices = @transform_3, window_bounds = array<i64: 1, 2, 2, 64>}]} {
    %c0 = arith.constant 0 : index
    %c0_0 = arith.constant 0 : index
    %0 = vector.load %arg3[%c0, %c0_0] : memref<1x64xf32, #tpu.memory_space<vmem>>, vector<1x64xf32>
    %c0_i32 = arith.constant 0 : i32
    %c2_i32 = arith.constant 2 : i32
    %1 = arith.addi %c0_i32, %c2_i32 : i32
    %c1_i32 = arith.constant 1 : i32
    scf.for %arg5 = %c0_i32 to %1 step %c1_i32  : i32 {
      %cst = arith.constant 0.000000e+00 : f32
      %2 = vector.broadcast %cst : f32 to vector<2x64xf32>
      %c1_i32_2 = arith.constant 1 : i32
      %3 = arith.muli %c1_i32_2, %arg5 : i32
      %c0_i32_3 = arith.constant 0 : i32
      %4 = arith.addi %3, %c0_i32_3 : i32
      %c0_4 = arith.constant 0 : index
      %5 = arith.index_cast %4 : i32 to index
      %c0_5 = arith.constant 0 : index
      %c0_6 = arith.constant 0 : index
      %c0_7 = arith.constant 0 : index
      %6 = vector.load %arg1[%c0_4, %5, %c0_5, %c0_6, %c0_7] : memref<1x4x1x4x64xbf16, #tpu.memory_space<vmem>>, vector<1x1x1x4x64xbf16>
      %7 = vector.shape_cast %6 : vector<1x1x1x4x64xbf16> to vector<1x4x64xbf16>
      %8 = vector.extract_strided_slice %7 {offsets = [0, 0, 0], sizes = [1, 2, 64], strides = [1, 1, 1]} : vector<1x4x64xbf16> to vector<1x2x64xbf16>
      %9 = vector.shape_cast %8 : vector<1x2x64xbf16> to vector<2x64xbf16>
      %c0_8 = arith.constant 0 : index
      %c0_9 = arith.constant 0 : index
      %c0_10 = arith.constant 0 : index
      %10 = vector.load %arg2[%c0_8, %c0_9, %c0_10] : memref<9x64x64xbf16, #tpu.memory_space<vmem>>, vector<1x64x64xbf16>
      %11 = vector.shape_cast %10 : vector<1x64x64xbf16> to vector<64x64xbf16>
      %cst_11 = arith.constant dense<0.000000e+00> : vector<2x64xf32>
      %12 = tpu.matmul %9, %11, %cst_11 {dimension_numbers = #tpu.dot_dimension_numbers<[1], [0], [0], [1], [0, 0, 1, 1], [], []>} : vector<2x64xbf16>, vector<64x64xbf16>, vector<2x64xf32> -> vector<2x64xf32>
      %13 = arith.addf %2, %12 : vector<2x64xf32>
      %14 = vector.extract_strided_slice %7 {offsets = [0, 1, 0], sizes = [1, 2, 64], strides = [1, 1, 1]} : vector<1x4x64xbf16> to vector<1x2x64xbf16>
      %15 = vector.shape_cast %14 : vector<1x2x64xbf16> to vector<2x64xbf16>
      %c1 = arith.constant 1 : index
      %c0_12 = arith.constant 0 : index
      %c0_13 = arith.constant 0 : index
      %16 = vector.load %arg2[%c1, %c0_12, %c0_13] : memref<9x64x64xbf16, #tpu.memory_space<vmem>>, vector<1x64x64xbf16>
      %17 = vector.shape_cast %16 : vector<1x64x64xbf16> to vector<64x64xbf16>
      %cst_14 = arith.constant dense<0.000000e+00> : vector<2x64xf32>
      %18 = tpu.matmul %15, %17, %cst_14 {dimension_numbers = #tpu.dot_dimension_numbers<[1], [0], [0], [1], [0, 0, 1, 1], [], []>} : vector<2x64xbf16>, vector<64x64xbf16>, vector<2x64xf32> -> vector<2x64xf32>
      %19 = arith.addf %13, %18 : vector<2x64xf32>
      %20 = vector.extract_strided_slice %7 {offsets = [0, 2, 0], sizes = [1, 2, 64], strides = [1, 1, 1]} : vector<1x4x64xbf16> to vector<1x2x64xbf16>
      %21 = vector.shape_cast %20 : vector<1x2x64xbf16> to vector<2x64xbf16>
      %c2 = arith.constant 2 : index
      %c0_15 = arith.constant 0 : index
      %c0_16 = arith.constant 0 : index
      %22 = vector.load %arg2[%c2, %c0_15, %c0_16] : memref<9x64x64xbf16, #tpu.memory_space<vmem>>, vector<1x64x64xbf16>
      %23 = vector.shape_cast %22 : vector<1x64x64xbf16> to vector<64x64xbf16>
      %cst_17 = arith.constant dense<0.000000e+00> : vector<2x64xf32>
      %24 = tpu.matmul %21, %23, %cst_17 {dimension_numbers = #tpu.dot_dimension_numbers<[1], [0], [0], [1], [0, 0, 1, 1], [], []>} : vector<2x64xbf16>, vector<64x64xbf16>, vector<2x64xf32> -> vector<2x64xf32>
      %25 = arith.addf %19, %24 : vector<2x64xf32>
      %c1_i32_18 = arith.constant 1 : i32
      %26 = arith.muli %c1_i32_18, %arg5 : i32
      %c1_i32_19 = arith.constant 1 : i32
      %27 = arith.addi %26, %c1_i32_19 : i32
      %c0_20 = arith.constant 0 : index
      %28 = arith.index_cast %27 : i32 to index
      %c0_21 = arith.constant 0 : index
      %c0_22 = arith.constant 0 : index
      %c0_23 = arith.constant 0 : index
      %29 = vector.load %arg1[%c0_20, %28, %c0_21, %c0_22, %c0_23] : memref<1x4x1x4x64xbf16, #tpu.memory_space<vmem>>, vector<1x1x1x4x64xbf16>
      %30 = vector.shape_cast %29 : vector<1x1x1x4x64xbf16> to vector<1x4x64xbf16>
      %31 = vector.extract_strided_slice %30 {offsets = [0, 0, 0], sizes = [1, 2, 64], strides = [1, 1, 1]} : vector<1x4x64xbf16> to vector<1x2x64xbf16>
      %32 = vector.shape_cast %31 : vector<1x2x64xbf16> to vector<2x64xbf16>
      %c3 = arith.constant 3 : index
      %c0_24 = arith.constant 0 : index
      %c0_25 = arith.constant 0 : index
      %33 = vector.load %arg2[%c3, %c0_24, %c0_25] : memref<9x64x64xbf16, #tpu.memory_space<vmem>>, vector<1x64x64xbf16>
      %34 = vector.shape_cast %33 : vector<1x64x64xbf16> to vector<64x64xbf16>
      %cst_26 = arith.constant dense<0.000000e+00> : vector<2x64xf32>
      %35 = tpu.matmul %32, %34, %cst_26 {dimension_numbers = #tpu.dot_dimension_numbers<[1], [0], [0], [1], [0, 0, 1, 1], [], []>} : vector<2x64xbf16>, vector<64x64xbf16>, vector<2x64xf32> -> vector<2x64xf32>
      %36 = arith.addf %25, %35 : vector<2x64xf32>
      %37 = vector.extract_strided_slice %30 {offsets = [0, 1, 0], sizes = [1, 2, 64], strides = [1, 1, 1]} : vector<1x4x64xbf16> to vector<1x2x64xbf16>
      %38 = vector.shape_cast %37 : vector<1x2x64xbf16> to vector<2x64xbf16>
      %c4 = arith.constant 4 : index
      %c0_27 = arith.constant 0 : index
      %c0_28 = arith.constant 0 : index
      %39 = vector.load %arg2[%c4, %c0_27, %c0_28] : memref<9x64x64xbf16, #tpu.memory_space<vmem>>, vector<1x64x64xbf16>
      %40 = vector.shape_cast %39 : vector<1x64x64xbf16> to vector<64x64xbf16>
      %cst_29 = arith.constant dense<0.000000e+00> : vector<2x64xf32>
      %41 = tpu.matmul %38, %40, %cst_29 {dimension_numbers = #tpu.dot_dimension_numbers<[1], [0], [0], [1], [0, 0, 1, 1], [], []>} : vector<2x64xbf16>, vector<64x64xbf16>, vector<2x64xf32> -> vector<2x64xf32>
      %42 = arith.addf %36, %41 : vector<2x64xf32>
      %43 = vector.extract_strided_slice %30 {offsets = [0, 2, 0], sizes = [1, 2, 64], strides = [1, 1, 1]} : vector<1x4x64xbf16> to vector<1x2x64xbf16>
      %44 = vector.shape_cast %43 : vector<1x2x64xbf16> to vector<2x64xbf16>
      %c5 = arith.constant 5 : index
      %c0_30 = arith.constant 0 : index
      %c0_31 = arith.constant 0 : index
      %45 = vector.load %arg2[%c5, %c0_30, %c0_31] : memref<9x64x64xbf16, #tpu.memory_space<vmem>>, vector<1x64x64xbf16>
      %46 = vector.shape_cast %45 : vector<1x64x64xbf16> to vector<64x64xbf16>
      %cst_32 = arith.constant dense<0.000000e+00> : vector<2x64xf32>
      %47 = tpu.matmul %44, %46, %cst_32 {dimension_numbers = #tpu.dot_dimension_numbers<[1], [0], [0], [1], [0, 0, 1, 1], [], []>} : vector<2x64xbf16>, vector<64x64xbf16>, vector<2x64xf32> -> vector<2x64xf32>
      %48 = arith.addf %42, %47 : vector<2x64xf32>
      %c1_i32_33 = arith.constant 1 : i32
      %49 = arith.muli %c1_i32_33, %arg5 : i32
      %c2_i32_34 = arith.constant 2 : i32
      %50 = arith.addi %49, %c2_i32_34 : i32
      %c0_35 = arith.constant 0 : index
      %51 = arith.index_cast %50 : i32 to index
      %c0_36 = arith.constant 0 : index
      %c0_37 = arith.constant 0 : index
      %c0_38 = arith.constant 0 : index
      %52 = vector.load %arg1[%c0_35, %51, %c0_36, %c0_37, %c0_38] : memref<1x4x1x4x64xbf16, #tpu.memory_space<vmem>>, vector<1x1x1x4x64xbf16>
      %53 = vector.shape_cast %52 : vector<1x1x1x4x64xbf16> to vector<1x4x64xbf16>
      %54 = vector.extract_strided_slice %53 {offsets = [0, 0, 0], sizes = [1, 2, 64], strides = [1, 1, 1]} : vector<1x4x64xbf16> to vector<1x2x64xbf16>
      %55 = vector.shape_cast %54 : vector<1x2x64xbf16> to vector<2x64xbf16>
      %c6 = arith.constant 6 : index
      %c0_39 = arith.constant 0 : index
      %c0_40 = arith.constant 0 : index
      %56 = vector.load %arg2[%c6, %c0_39, %c0_40] : memref<9x64x64xbf16, #tpu.memory_space<vmem>>, vector<1x64x64xbf16>
      %57 = vector.shape_cast %56 : vector<1x64x64xbf16> to vector<64x64xbf16>
      %cst_41 = arith.constant dense<0.000000e+00> : vector<2x64xf32>
      %58 = tpu.matmul %55, %57, %cst_41 {dimension_numbers = #tpu.dot_dimension_numbers<[1], [0], [0], [1], [0, 0, 1, 1], [], []>} : vector<2x64xbf16>, vector<64x64xbf16>, vector<2x64xf32> -> vector<2x64xf32>
      %59 = arith.addf %48, %58 : vector<2x64xf32>
      %60 = vector.extract_strided_slice %53 {offsets = [0, 1, 0], sizes = [1, 2, 64], strides = [1, 1, 1]} : vector<1x4x64xbf16> to vector<1x2x64xbf16>
      %61 = vector.shape_cast %60 : vector<1x2x64xbf16> to vector<2x64xbf16>
      %c7 = arith.constant 7 : index
      %c0_42 = arith.constant 0 : index
      %c0_43 = arith.constant 0 : index
      %62 = vector.load %arg2[%c7, %c0_42, %c0_43] : memref<9x64x64xbf16, #tpu.memory_space<vmem>>, vector<1x64x64xbf16>
      %63 = vector.shape_cast %62 : vector<1x64x64xbf16> to vector<64x64xbf16>
      %cst_44 = arith.constant dense<0.000000e+00> : vector<2x64xf32>
      %64 = tpu.matmul %61, %63, %cst_44 {dimension_numbers = #tpu.dot_dimension_numbers<[1], [0], [0], [1], [0, 0, 1, 1], [], []>} : vector<2x64xbf16>, vector<64x64xbf16>, vector<2x64xf32> -> vector<2x64xf32>
      %65 = arith.addf %59, %64 : vector<2x64xf32>
      %66 = vector.extract_strided_slice %53 {offsets = [0, 2, 0], sizes = [1, 2, 64], strides = [1, 1, 1]} : vector<1x4x64xbf16> to vector<1x2x64xbf16>
      %67 = vector.shape_cast %66 : vector<1x2x64xbf16> to vector<2x64xbf16>
      %c8 = arith.constant 8 : index
      %c0_45 = arith.constant 0 : index
      %c0_46 = arith.constant 0 : index
      %68 = vector.load %arg2[%c8, %c0_45, %c0_46] : memref<9x64x64xbf16, #tpu.memory_space<vmem>>, vector<1x64x64xbf16>
      %69 = vector.shape_cast %68 : vector<1x64x64xbf16> to vector<64x64xbf16>
      %cst_47 = arith.constant dense<0.000000e+00> : vector<2x64xf32>
      %70 = tpu.matmul %67, %69, %cst_47 {dimension_numbers = #tpu.dot_dimension_numbers<[1], [0], [0], [1], [0, 0, 1, 1], [], []>} : vector<2x64xbf16>, vector<64x64xbf16>, vector<2x64xf32> -> vector<2x64xf32>
      %71 = arith.addf %65, %70 : vector<2x64xf32>
      %72 = vector.broadcast %0 : vector<1x64xf32> to vector<2x64xf32>
      %73 = arith.addf %71, %72 : vector<2x64xf32>
      %cst_48 = arith.constant 0.000000e+00 : f32
      %74 = vector.broadcast %cst_48 : f32 to vector<2x64xf32>
      %75 = arith.maximumf %73, %74 : vector<2x64xf32>
      %76 = arith.truncf %75 : vector<2x64xf32> to vector<2x64xbf16>
      %c0_49 = arith.constant 0 : index
      %77 = arith.index_cast %arg5 : i32 to index
      %c0_50 = arith.constant 0 : index
      %c0_51 = arith.constant 0 : index
      %78 = vector.load %arg4[%c0_49, %77, %c0_50, %c0_51] : memref<1x2x2x64xbf16, #tpu.memory_space<vmem>>, vector<1x1x2x64xbf16>
      %79 = vector.shape_cast %78 : vector<1x1x2x64xbf16> to vector<2x64xbf16>
      %80 = vector.shape_cast %76 : vector<2x64xbf16> to vector<1x1x2x64xbf16>
      tpu.vector_store %arg4[%c0_49, %77, %c0_50, %c0_51], %80 {strides = array<i32>} : memref<1x2x2x64xbf16, #tpu.memory_space<vmem>>, vector<1x1x2x64xbf16>,
    }
    %c2_i32_1 = arith.constant 2 : i32
    return
  }
  func.func @transform_0(%arg0: i32) -> (i32, i32, i32, i32, i32) {
    %c0_i32 = arith.constant 0 : i32
    %c0_i32_0 = arith.constant 0 : i32
    %c0_i32_1 = arith.constant 0 : i32
    %c0_i32_2 = arith.constant 0 : i32
    %c0_i32_3 = arith.constant 0 : i32
    return %arg0, %c0_i32, %c0_i32_0, %c0_i32_1, %c0_i32_2 : i32, i32, i32, i32, i32
  }
  func.func @transform_1(%arg0: i32) -> (i32, i32, i32) {
    %c0_i32 = arith.constant 0 : i32
    %c0_i32_0 = arith.constant 0 : i32
    %c0_i32_1 = arith.constant 0 : i32
    %c0_i32_2 = arith.constant 0 : i32
    return %c0_i32, %c0_i32_0, %c0_i32_1 : i32, i32, i32
  }
  func.func @transform_2(%arg0: i32) -> (i32, i32) {
    %c0_i32 = arith.constant 0 : i32
    %c0_i32_0 = arith.constant 0 : i32
    %c0_i32_1 = arith.constant 0 : i32
    return %c0_i32, %c0_i32_0 : i32, i32
  }
  func.func @transform_3(%arg0: i32) -> (i32, i32, i32, i32) {
    %c0_i32 = arith.constant 0 : i32
    %c0_i32_0 = arith.constant 0 : i32
    %c0_i32_1 = arith.constant 0 : i32
    %c0_i32_2 = arith.constant 0 : i32
    return %arg0, %c0_i32, %c0_i32_0, %c0_i32_1 : i32, i32, i32, i32
  }
}

module attributes {stable_mosaic.version = 11 : i64} {
  func.func @_linear_kernel(%arg0: i32, %arg1: memref<8x256xbf16, #tpu.memory_space<vmem>>, %arg2: memref<256x32xbf16, #tpu.memory_space<vmem>>, %arg3: memref<1x32xf32, #tpu.memory_space<vmem>>, %arg4: memref<8x32xf32, #tpu.memory_space<vmem>>) attributes {dimension_semantics = [#tpu.dimension_semantics<parallel>], iteration_bounds = array<i64: 1>, scalar_prefetch = 0 : i64, scratch_operands = 0 : i64, tpu.core_type = #tpu.core_type<tc>, window_params = [{transform_indices = @transform_0, window_bounds = array<i64: 8, 256>}, {pipeline_mode = #tpu.pipeline_mode<synchronous>, transform_indices = @transform_1, window_bounds = array<i64: 256, 32>}, {pipeline_mode = #tpu.pipeline_mode<synchronous>, transform_indices = @transform_2, window_bounds = array<i64: 1, 32>}, {transform_indices = @transform_3, window_bounds = array<i64: 8, 32>}]} {
    %c0 = arith.constant 0 : index
    %c0_0 = arith.constant 0 : index
    %0 = vector.load %arg1[%c0, %c0_0] : memref<8x256xbf16, #tpu.memory_space<vmem>>, vector<8x256xbf16>
    %c0_1 = arith.constant 0 : index
    %c0_2 = arith.constant 0 : index
    %1 = vector.load %arg2[%c0_1, %c0_2] : memref<256x32xbf16, #tpu.memory_space<vmem>>, vector<256x32xbf16>
    %cst = arith.constant dense<0.000000e+00> : vector<8x32xf32>
    %2 = tpu.matmul %0, %1, %cst {dimension_numbers = #tpu.dot_dimension_numbers<[1], [0], [0], [1], [0, 0, 1, 1], [], []>} : vector<8x256xbf16>, vector<256x32xbf16>, vector<8x32xf32> -> vector<8x32xf32>
    %c0_3 = arith.constant 0 : index
    %c0_4 = arith.constant 0 : index
    %3 = vector.load %arg3[%c0_3, %c0_4] : memref<1x32xf32, #tpu.memory_space<vmem>>, vector<1x32xf32>
    %4 = vector.broadcast %3 : vector<1x32xf32> to vector<8x32xf32>
    %5 = arith.addf %2, %4 : vector<8x32xf32>
    %c0_5 = arith.constant 0 : index
    %c0_6 = arith.constant 0 : index
    %6 = vector.load %arg4[%c0_5, %c0_6] : memref<8x32xf32, #tpu.memory_space<vmem>>, vector<8x32xf32>
    tpu.vector_store %arg4[%c0_5, %c0_6], %5 {strides = array<i32>} : memref<8x32xf32, #tpu.memory_space<vmem>>, vector<8x32xf32>,
    return
  }
  func.func @transform_0(%arg0: i32) -> (i32, i32) {
    %c0_i32 = arith.constant 0 : i32
    %c0_i32_0 = arith.constant 0 : i32
    return %arg0, %c0_i32 : i32, i32
  }
  func.func @transform_1(%arg0: i32) -> (i32, i32) {
    %c0_i32 = arith.constant 0 : i32
    %c0_i32_0 = arith.constant 0 : i32
    %c0_i32_1 = arith.constant 0 : i32
    return %c0_i32, %c0_i32_0 : i32, i32
  }
  func.func @transform_2(%arg0: i32) -> (i32, i32) {
    %c0_i32 = arith.constant 0 : i32
    %c0_i32_0 = arith.constant 0 : i32
    %c0_i32_1 = arith.constant 0 : i32
    return %c0_i32, %c0_i32_0 : i32, i32
  }
  func.func @transform_3(%arg0: i32) -> (i32, i32) {
    %c0_i32 = arith.constant 0 : i32
    %c0_i32_0 = arith.constant 0 : i32
    return %arg0, %c0_i32 : i32, i32
  }
}

</mosaic_0001>

<bundles_post_ra>
// kernel: vicreg_encoder_forward.6
= control target key start
LH: loop header
LB: loop body
LE: loop exit
PB: predicated region body
PF: predicated region fallthrough
CT: control target
= control target key end

     0   :  { %s1126_s12 = smov 0   ;;  %s1272_s0 = inlined_call_operand.vmem [shape: bf16[2,10,2,5,32], index: 0, kind: input, shape index: {}]   ;;  %s1273_s1 = inlined_call_operand.vmem [shape: bf16[9,32,64], index: 1, kind: input, shape index: {}]   ;;  %s1274_s2 = inlined_call_operand.vmem [shape: f32[1,64], index: 2, kind: input, shape index: {}]   ;;  %s1275_s3 = inlined_call_operand.vmem [shape: bf16[2,4,4,64], index: 3, kind: output, shape index: {}]  }
   0x1 LB: > { %s859_s13 = sadd.s32 4294967295, %s1098_s12   ;;  %p863_p0 = scmp.ge.s32.totalorder %s1098_s12, 1  ;;  %s1098_s12 = sphi %s1126_s12, %s13_s12  }
   0x2   : > { %p137_p1 = scmp.lt.s32.totalorder %s1098_s12, 3 }
   0x4   : > { %p138_p2 = pnand %p863_p0, %p137_p1 }
   0x5   : > { %p161_p3 = scmp.lt.s32.totalorder (!%p138_p2), %s859_s13, 1  ;;  %v1137_v0 = vld [vmem:[%s1274_s2] ss:$0 sm:$0xff] (!%p138_p2)  ;;  %s1149_s24 = smov (!%p138_p2), 0  }
   0x6   : > { %141 = sbr.rel (%p138_p2) target bundleno = 279 (0x117), region = 32 }
   0xd   : > { %s1277_s13 = smov (!%p161_p3, %s859_s13), 1 }
   0xe   : > { %s1048_s16 = smul.u32 80, %s1277_s13  ;;  %s944_s17 = sshll.u32 %s1277_s13, 3 }
   0xf   : > { %s1142_s20 = scalar_lea.vmem %s1275_s3, %s944_s17 }
  0x10   : > { %s1147_s23 = scalar_lea.vmem %s1272_s0, %s1048_s16 }
  0x11 LB: >> { %v1067_v1 = vld [vmem:[%s1273_s1 + $0x10] sm:$0xff]   ;;  %v1104_v2 = vmov 0.0   ;;  %v1068_v3 = vld [vmem:[%s1273_s1] sm:$0xff]   ;;  %v1069_v4 = vld [vmem:[%s1273_s1 + $0x18] sm:$0xff]   ;;  %vm1105_vm0 = vmmov 0   ;;  %s946_s4 = sshll.u32 %s1102_s24, 4  ;;  %s1102_s24 = sphi %s1149_s24, %s178_s24  }
  0x12   : >> { %976 = vmatprep.subr.bf16.mxu0 %v1104_v2  ;;  %984 = vmatprep.subr.bf16.mxu1 %v1104_v2  ;;  %v1070_v5 = vld [vmem:[%s1273_s1 + $0x8] sm:$0xff]   ;;  %s1173_s7 = scalar_lea.vmem %s1147_s23, %s946_s4  ;;  %vm206_vm1 = vcmask 261120   ;;  %v1072_v9 = vld [vmem:[%s1273_s1 + $0x20] sm:$0xff]   ;;  %v1073_v11 = vld [vmem:[%s1273_s1 + $0x30] sm:$0xff]   ;;  %vm785_vm2 = vcmask 517120  }
  0x13   : >> { %977 = vmatpush3.bf16.msra.mxu0 %v1067_v1  ;;  %980 = vmatprep.mubr.msk.bf16.mxu0 %vm1105_vm0, %v1104_v2  ;;  %v183_v6 = vld [vmem:[%s1173_s7] sm:$0x7]  ;;  %v184_v7 = vld [vmem:[%s1173_s7 + $0x4] sm:$0x7]  ;;  %v890_v14 = vld [vmem:[%s1173_s7 + $0x8] sm:$0x7] }
  0x14   : >> { %985 = vmatpush3.bf16.msra.mxu1 %v1068_v3  ;;  %978 = vmatprep.subr.bf16.mxu0 %v1104_v2  ;;  %v884_v8 = vcombine.low %v183_v6, %v183_v6  ;;  %v1074_v15 = vld [vmem:[%s1273_s1 + $0x28] sm:$0xff]   ;;  %v910_v16 = vcombine.low %v890_v14, %v890_v14  ;;  %v1075_v17 = vld [vmem:[%s1273_s1 + $0x38] sm:$0xff]   ;;  %v1076_v19 = vld [vmem:[%s1273_s1 + $0x40] sm:$0xff]  }
  0x15   : >> { %986 = vmatprep.subr.bf16.mxu1 %v1104_v2  ;;  %988 = vmatprep.mubr.msk.bf16.mxu1 %vm1105_vm0, %v1104_v2  ;;  %v1078_v21 = vld [vmem:[%s1273_s1 + $0x50] sm:$0xff]   ;;  %v1079_v22 = vld [vmem:[%s1273_s1 + $0x48] sm:$0xff]   ;;  %v1080_v25 = vld [vmem:[%s1273_s1 + $0x58] sm:$0xff]  }
  0x16   : >> { %v316_v10 = vshll.u32 %v884_v8, 16  ;;  %v314_v12 = vshrl.u32 %v884_v8, 16  ;;  %v515_v20 = vshll.u32 %v910_v16, 16  ;;  %v513_v23 = vshrl.u32 %v910_v16, 16  ;;  %v891_v27 = vld [vmem:[%s1173_s7 + $0xc] sm:$0x7] }
  0x17   : >> { %979 = vmatpush3.bf16.msra.mxu0 %v1069_v4  ;;  %v1081_v28 = vld [vmem:[%s1273_s1 + $0x60] sm:$0xff]   ;;  %v916_v29 = vld [vmem:[%s1173_s7 + $0x10] sm:$0x7]  ;;  %v1083_v32 = vld [vmem:[%s1273_s1 + $0x68] sm:$0xff]  }
  0x18   : >> { %987 = vmatpush3.bf16.msra.mxu1 %v1070_v5  ;;  %992 = vmatprep.subr.bf16.mxu0 %v1104_v2  ;;  %v318_v13 = vrot.slane %v316_v10, 1  ;;  %v517_v24 = vrot.slane %v515_v20, 1  ;;  %v1082_v30 = vld [vmem:[%s1273_s1 + $0x70] sm:$0xff]   ;;  %v936_v31 = vcombine.low %v916_v29, %v916_v29  ;;  %v1084_v33 = vld [vmem:[%s1273_s1 + $0x78] sm:$0xff]   ;;  %v1086_v35 = vld [vmem:[%s1273_s1 + $0x80] sm:$0xff]  }
  0x19   : >> { %1000 = vmatprep.subr.bf16.mxu1 %v1104_v2  ;;  %v917_v36 = vld [vmem:[%s1173_s7 + $0x14] sm:$0x7]  ;;  %v1087_v39 = vld [vmem:[%s1273_s1 + $0x88] sm:$0xff]   ;;  %s941_s7 = sshll.u32 %s1102_s24, 1  ;;  %s178_s24 = sadd.s32 1, %s1102_s24  }
  0x1a   : >> { %981 = vmatmul.mubr.msk.bf16.vlgmr.msra.gmra.mrb[0].mxu0 %vm206_vm1, %v184_v7  ;;  %v319_v18 = vor.u32 %v318_v13, %v314_v12  ;;  %v518_v26 = vor.u32 %v517_v24, %v513_v23  ;;  %v714_v34 = vshll.u32 %v936_v31, 16  ;;  %v712_v37 = vshrl.u32 %v936_v31, 16  ;;  %s784_s15 = scalar_lea.vmem %s1142_s20, %s941_s7  ;;  %p175_p4 = scmp.ge.s32.totalorder %s178_s24, 4  }
  0x1b   : >> { %989 = vmatmul.mubr.msk.bf16.vlgmr.msra.gmra.mrb[0].mxu1 %vm206_vm1, %v183_v6  ;;  %993 = vmatpush3.bf16.msra.mxu0 %v1072_v9 }
  0x1c   : >> { %1001 = vmatpush3.bf16.msra.mxu1 %v1073_v11  ;;  %994 = vmatprep.subr.bf16.mxu0 %v1104_v2  ;;  %v716_v38 = vrot.slane %v714_v34, 1 }
  0x1d   : >> { %1002 = vmatprep.subr.bf16.mxu1 %v1104_v2  ;;  %996 = vmatprep.mubr.msk.bf16.mxu0 %vm1105_vm0, %v1104_v2 }
  0x1e   : >> { %1004 = vmatprep.mubr.msk.bf16.mxu1 %vm1105_vm0, %v1104_v2  ;;  %v717_v40 = vor.u32 %v716_v38, %v712_v37 }
  0x1f   : >> { %995 = vmatpush3.bf16.msra.mxu0 %v1074_v15 }
  0x20   : >> { %1003 = vmatpush3.bf16.msra.mxu1 %v1075_v17  ;;  %1008 = vmatprep.subr.bf16.mxu0 %v1104_v2 }
  0x21   : >> { %1016 = vmatprep.subr.bf16.mxu1 %v1104_v2 }
  0x22   : >> { %997 = vmatmul.mubr.msk.bf16.vlgmr.msra.gmra.mrb[4].mxu0 %vm206_vm1, %v319_v18 }
  0x23   : >> { %1009 = vmatpush3.bf16.msra.mxu0 %v1076_v19  ;;  %1005 = vmatmul.mubr.msk.bf16.vlgmr.msra.gmra.mrb[4].mxu1 %vm206_vm1, %v890_v14 }
  0x24   : >> { %1017 = vmatpush3.bf16.msra.mxu1 %v1078_v21  ;;  %1010 = vmatprep.subr.bf16.mxu0 %v1104_v2 }
  0x25   : >> { %1018 = vmatprep.subr.bf16.mxu1 %v1104_v2  ;;  %1012 = vmatprep.mubr.msk.bf16.mxu0 %vm1105_vm0, %v1104_v2 }
  0x26   : >> { %1020 = vmatprep.mubr.msk.bf16.mxu1 %vm1105_vm0, %v1104_v2 }
  0x27   : >> { %1011 = vmatpush3.bf16.msra.mxu0 %v1079_v22 }
  0x28   : >> { %1019 = vmatpush3.bf16.msra.mxu1 %v1080_v25  ;;  %1024 = vmatprep.subr.bf16.mxu0 %v1104_v2 }
  0x29   : >> { %1032 = vmatprep.subr.bf16.mxu1 %v1104_v2 }
  0x2a   : >> { %1013 = vmatmul.mubr.msk.bf16.vlgmr.msra.gmra.mrb[8].mxu0 %vm206_vm1, %v891_v27 }
  0x2b   : >> { %1025 = vmatpush3.bf16.msra.mxu0 %v1081_v28  ;;  %1021 = vmatmul.mubr.msk.bf16.vlgmr.msra.gmra.mrb[8].mxu1 %vm206_vm1, %v518_v26 }
  0x2c   : >> { %1033 = vmatpush3.bf16.msra.mxu1 %v1082_v30  ;;  %1026 = vmatprep.subr.bf16.mxu0 %v1104_v2 }
  0x2d   : >> { %1034 = vmatprep.subr.bf16.mxu1 %v1104_v2  ;;  %1028 = vmatprep.mubr.msk.bf16.mxu0 %vm1105_vm0, %v1104_v2 }
  0x2e   : >> { %1036 = vmatprep.mubr.msk.bf16.mxu1 %vm1105_vm0, %v1104_v2 }
  0x2f   : >> { %1027 = vmatpush3.bf16.msra.mxu0 %v1083_v32 }
  0x30   : >> { %1035 = vmatpush3.bf16.msra.mxu1 %v1084_v33  ;;  %1040 = vmatprep.subr.bf16.mxu0 %v1104_v2 }
  0x32   : >> { %1029 = vmatmul.mubr.msk.bf16.vlgmr.msra.gmra.mrb[12].mxu0 %vm206_vm1, %v916_v29 }
  0x33   : >> { %1041 = vmatpush3.bf16.msra.mxu0 %v1086_v35  ;;  %1037 = vmatmul.mubr.msk.bf16.vlgmr.msra.gmra.mrb[12].mxu1 %vm206_vm1, %v917_v36 }
  0x34   : >> { %1042 = vmatprep.subr.bf16.mxu0 %v1104_v2  ;;  %1044 = vmatprep.mubr.msk.bf16.mxu0 %vm1105_vm0, %v1104_v2 }
  0x37   : >> { %1043 = vmatpush3.bf16.msra.mxu0 %v1087_v39 }
  0x3a   : >> { %1045 = vmatmul.mubr.msk.bf16.vlgmr.msra.gmra.mrb[16].mxu0 %vm206_vm1, %v717_v40 }
  0xed   : >> { %v244_v41 = vpop.f32.mrb[0].mxu0 }
  0xee   : >> { %v982_v42 = vpop.f32.mrb[1].mxu0  ;;  %v299_v43 = vpop.f32.mrb[0].mxu1 }
  0xef   : >> { %v300_v44 = vadd.f32 %v299_v43, %v244_v41  ;;  %v247_v45 = vpop.f32.mrb[2].mxu0  ;;  %v990_v46 = vpop.f32.mrb[1].mxu1 }
  0xf0   : >> { %v983_v47 = vpop.f32.mrb[3].mxu0  ;;  %v302_v48 = vpop.f32.mrb[2].mxu1 }
  0xf1   : >> { %v991_v49 = vpop.f32.mrb[3].mxu1 }
  0xf5   : >> { %v369_v50 = vpop.f32.mrb[4].mxu0 }
  0xf6   : >> { %v375_v51 = vadd.f32 %v369_v50, %v300_v44  ;;  %v998_v52 = vpop.f32.mrb[5].mxu0  ;;  %v436_v53 = vpop.f32.mrb[4].mxu1 }
  0xf7   : >> { %v372_v54 = vpop.f32.mrb[6].mxu0  ;;  %v1006_v55 = vpop.f32.mrb[5].mxu1 }
  0xf8   : >> { %v442_v56 = vadd.f32 %v436_v53, %v375_v51  ;;  %v999_v57 = vpop.f32.mrb[7].mxu0  ;;  %v439_v58 = vpop.f32.mrb[6].mxu1 }
  0xf9   : >> { %v1007_v59 = vpop.f32.mrb[7].mxu1 }
  0xfd   : >> { %v497_v60 = vpop.f32.mrb[8].mxu0 }
  0xfe   : >> { %v503_v61 = vadd.f32 %v497_v60, %v442_v56  ;;  %v1014_v62 = vpop.f32.mrb[9].mxu0  ;;  %v568_v63 = vpop.f32.mrb[8].mxu1 }
  0xff   : >> { %v500_v1 = vpop.f32.mrb[10].mxu0  ;;  %v1022_v2 = vpop.f32.mrb[9].mxu1 }
 0x100   : >> { %v574_v3 = vadd.f32 %v568_v63, %v503_v61  ;;  %v1015_v4 = vpop.f32.mrb[11].mxu0  ;;  %v571_v5 = vpop.f32.mrb[10].mxu1 }
 0x101   : >> { %v1023_v6 = vpop.f32.mrb[11].mxu1 }
 0x105   : >> { %v635_v7 = vpop.f32.mrb[12].mxu0 }
 0x106   : >> { %v641_v8 = vadd.f32 %v635_v7, %v574_v3  ;;  %v1030_v9 = vpop.f32.mrb[13].mxu0  ;;  %v696_v10 = vpop.f32.mrb[12].mxu1 }
 0x107   : >> { %v638_v11 = vpop.f32.mrb[14].mxu0  ;;  %v1038_v12 = vpop.f32.mrb[13].mxu1 }
 0x108   : >> { %v702_v13 = vadd.f32 %v696_v10, %v641_v8  ;;  %v1031_v14 = vpop.f32.mrb[15].mxu0  ;;  %v699_v15 = vpop.f32.mrb[14].mxu1 }
 0x109   : >> { %v1039_v16 = vpop.f32.mrb[15].mxu1 }
 0x10d   : >> { %v767_v17 = vpop.f32.mrb[16].mxu0 }
 0x10e   : >> { %v773_v18 = vadd.f32 %v767_v17, %v702_v13  ;;  %v1046_v19 = vpop.f32.mrb[17].mxu0 }
 0x10f   : >> { %v770_v20 = vpop.f32.mrb[18].mxu0 }
 0x110   : >> { %v780_v21 = vadd.f32 %v1137_v0, %v773_v18  ;;  %v1047_v22 = vpop.f32.mrb[19].mxu0  ;;  %177 = sbr.rel (!%p175_p4) target bundleno = 17 (0x11), region = 81 }
 0x112   : >> { %v781_v23 = vmax.f32 %v780_v21, 0.0 }
 0x114   : >> { %v782_v24 = vpack.c.bf16 %v781_v23, %v781_v23 }
 0x116   : >> { %786 = vst.msk [vmem:[%s784_s15] sm:$0x3] %vm785_vm2, %v782_v24 }
 0x117 PF: > { %s13_s12 = sadd.s32 1, %s1098_s12  }
 0x118   : > { %p10_p5 = scmp.ge.s32.totalorder %s13_s12, 4  }
 0x11a   :  { %12 = sbr.rel (!%p10_p5) target bundleno = 1 (0x1), region = 92 }

// kernel: vicreg_encoder_forward.5
= control target key start
LH: loop header
LB: loop body
LE: loop exit
PB: predicated region body
PF: predicated region fallthrough
CT: control target
= control target key end

     0   :  { %s943_s12 = smov 0   ;;  %s1065_s0 = inlined_call_operand.vmem [shape: bf16[2,18,2,9,4], index: 0, kind: input, shape index: {}]   ;;  %s1066_s1 = inlined_call_operand.vmem [shape: bf16[9,4,32], index: 1, kind: input, shape index: {}]   ;;  %s1067_s2 = inlined_call_operand.vmem [shape: f32[1,32], index: 2, kind: input, shape index: {}]   ;;  %s1068_s3 = inlined_call_operand.vmem [shape: bf16[2,8,8,32], index: 3, kind: output, shape index: {}]  }
   0x1 LB: > { %s761_s13 = sadd.s32 4294967295, %s915_s12   ;;  %p765_p0 = scmp.ge.s32.totalorder %s915_s12, 1  ;;  %s915_s12 = sphi %s943_s12, %s13_s12  }
   0x2   : > { %p137_p1 = scmp.lt.s32.totalorder %s915_s12, 3 }
   0x4   : > { %p138_p2 = pnand %p765_p0, %p137_p1 }
   0x5   : > { %p161_p3 = scmp.lt.s32.totalorder (!%p138_p2), %s761_s13, 1  ;;  %v954_v0 = vld [vmem:[%s1067_s2] ss:$0 sm:$0xff] (!%p138_p2)  ;;  %s966_s24 = smov (!%p138_p2), 0  }
   0x6   : > { %141 = sbr.rel (%p138_p2) target bundleno = 275 (0x113), region = 32 }
   0xd   : > { %s1070_s13 = smov (!%p161_p3, %s761_s13), 1 }
   0xe   : > { %s883_s16 = smul.u32 288, %s1070_s13  ;;  %s806_s17 = sshll.u32 %s1070_s13, 5 }
   0xf   : > { %s959_s20 = scalar_lea.vmem %s1068_s3, %s806_s17 }
  0x10   : > { %s964_s23 = scalar_lea.vmem %s1065_s0, %s883_s16 }
  0x11 LB: >> { %v772_v1 = vld [vmem:[%s1066_s1 + $0x2] sm:$0x3]  ;;  %vm193_vm0 = vcmask 1041408   ;;  %v186_v2 = vld [vmem:[%s1066_s1] sm:$0x3]  ;;  %v921_v3 = vmov 0.0   ;;  %s919_s24 = sphi %s966_s24, %s178_s24  }
  0x12   : >> { %829 = vmatprep.subr.bf16.mxu0 %v921_v3  ;;  %v195_v4 = vsel %vm193_vm0, %v772_v1, 0  ;;  %835 = vmatprep.subr.bf16.mxu1 %v921_v3  ;;  %v241_v5 = vsel %vm193_vm0, %v186_v2, 0  ;;  %v775_v6 = vld [vmem:[%s1066_s1 + $0x4] sm:$0x3]  ;;  %s808_s4 = sshll.u32 %s919_s24, 5  ;;  %vm189_vm1 = vcmask 31744  }
  0x13   : >> { %830 = vmatpush3.bf16.msra.mxu0 %v195_v4  ;;  %836 = vmatpush3.bf16.msra.mxu1 %v241_v5  ;;  %v783_v7 = vld [vmem:[%s1066_s1 + $0x6] sm:$0x3]  ;;  %vm922_vm2 = vmmov 0   ;;  %s991_s7 = scalar_lea.vmem %s964_s23, %s808_s4  ;;  %v301_v8 = vsel %vm193_vm0, %v775_v6, 0  ;;  %v785_v19 = vld [vmem:[%s1066_s1 + $0x8] sm:$0x3] }
  0x14   : >> { %831 = vmatprep.mubr.msk.bf16.mxu0 %vm922_vm2, %v921_v3  ;;  %837 = vmatprep.mubr.msk.bf16.mxu1 %vm922_vm2, %v921_v3  ;;  %v357_v9 = vsel %vm193_vm0, %v783_v7, 0  ;;  %v185_v10 = vld [vmem:[%s991_s7 + $0x8] sm:$0xf]  ;;  %v183_v11 = vld [vmem:[%s991_s7] sm:$0xf]  ;;  %v406_v24 = vsel %vm193_vm0, %v785_v19, 0 }
  0x15   : >> { %841 = vmatprep.subr.bf16.mxu0 %v921_v3  ;;  %v184_v12 = vld [vmem:[%s991_s7 + $0x4] sm:$0x1]  ;;  %847 = vmatprep.subr.bf16.mxu1 %v921_v3  ;;  %v780_v14 = vld [vmem:[%s991_s7 + $0x10] sm:$0xf]  ;;  %v781_v15 = vld [vmem:[%s991_s7 + $0x14] sm:$0x1] }
  0x16   : >> { %832 = vmatmul.mubr.msk.bf16.vlgmr.msra.gmra.mrb[0].mxu0 %vm189_vm1, %v185_v10  ;;  %838 = vmatmul.mubr.msk.bf16.vlgmr.msra.gmra.mrb[0].mxu1 %vm189_vm1, %v183_v11  ;;  %v776_v13 = vcombine.low %v183_v11, %v184_v12  ;;  %v788_v16 = vcombine.low %v780_v14, %v781_v15  ;;  %v787_v22 = vld [vmem:[%s1066_s1 + $0xa] sm:$0x3]  ;;  %v795_v28 = vld [vmem:[%s1066_s1 + $0xc] sm:$0x3]  ;;  %v797_v30 = vld [vmem:[%s1066_s1 + $0xe] sm:$0x3] }
  0x17   : >> { %842 = vmatpush3.bf16.msra.mxu0 %v301_v8  ;;  %843 = vmatprep.mubr.msk.bf16.mxu0 %vm922_vm2, %v921_v3  ;;  %v467_v25 = vsel %vm193_vm0, %v787_v22, 0  ;;  %v782_v31 = vld [vmem:[%s991_s7 + $0x18] sm:$0xf]  ;;  %v792_v32 = vld [vmem:[%s991_s7 + $0x20] sm:$0xf]  ;;  %v523_v34 = vsel %vm193_vm0, %v795_v28, 0 }
  0x18   : >> { %v291_v17 = vshrl.u32 %v776_v13, 16  ;;  %v293_v18 = vshll.u32 %v776_v13, 16  ;;  %848 = vmatpush3.bf16.msra.mxu1 %v357_v9  ;;  %853 = vmatprep.subr.bf16.mxu0 %v921_v3  ;;  %v459_v21 = vshll.u32 %v788_v16, 16  ;;  %v457_v26 = vshrl.u32 %v788_v16, 16  ;;  %v793_v33 = vld [vmem:[%s991_s7 + $0x24] sm:$0x1] }
  0x19   : >> { %849 = vmatprep.mubr.msk.bf16.mxu1 %vm922_vm2, %v921_v3  ;;  %859 = vmatprep.subr.bf16.mxu1 %v921_v3  ;;  %v572_v35 = vsel %vm193_vm0, %v797_v30, 0  ;;  %v800_v36 = vcombine.low %v792_v32, %v793_v33  ;;  %v799_v37 = vld [vmem:[%s1066_s1 + $0x10] sm:$0x3]  ;;  %v794_v39 = vld [vmem:[%s991_s7 + $0x28] sm:$0xf]  ;;  %s803_s19 = sshll.u32 %s919_s24, 2 }
  0x1a   : >> { %v295_v20 = vrot.slane %v293_v18, 1  ;;  %v461_v27 = vrot.slane %v459_v21, 1  ;;  %v633_v40 = vsel %vm193_vm0, %v799_v37, 0  ;;  %s686_s21 = scalar_lea.vmem %s959_s20, %s803_s19  ;;  %vm687_vm3 = vcmask 257024   ;;  %s178_s24 = sadd.s32 1, %s919_s24  }
  0x1b   : >> { %v625_v38 = vshll.u32 %v800_v36, 16  ;;  %v623_v41 = vshrl.u32 %v800_v36, 16  ;;  %p175_p4 = scmp.ge.s32.totalorder %s178_s24, 8  }
  0x1c   : >> { %v296_v23 = vor.u32 %v295_v20, %v291_v17  ;;  %v462_v29 = vor.u32 %v461_v27, %v457_v26 }
  0x1d   : >> { %v627_v42 = vrot.slane %v625_v38, 1 }
  0x1e   : >> { %844 = vmatmul.mubr.msk.bf16.vlgmr.msra.gmra.mrb[4].mxu0 %vm189_vm1, %v296_v23  ;;  %850 = vmatmul.mubr.msk.bf16.vlgmr.msra.gmra.mrb[4].mxu1 %vm189_vm1, %v780_v14 }
  0x1f   : >> { %854 = vmatpush3.bf16.msra.mxu0 %v406_v24  ;;  %855 = vmatprep.mubr.msk.bf16.mxu0 %vm922_vm2, %v921_v3  ;;  %v628_v43 = vor.u32 %v627_v42, %v623_v41 }
  0x20   : >> { %860 = vmatpush3.bf16.msra.mxu1 %v467_v25  ;;  %865 = vmatprep.subr.bf16.mxu0 %v921_v3 }
  0x21   : >> { %861 = vmatprep.mubr.msk.bf16.mxu1 %vm922_vm2, %v921_v3  ;;  %871 = vmatprep.subr.bf16.mxu1 %v921_v3 }
  0x26   : >> { %856 = vmatmul.mubr.msk.bf16.vlgmr.msra.gmra.mrb[8].mxu0 %vm189_vm1, %v782_v31  ;;  %862 = vmatmul.mubr.msk.bf16.vlgmr.msra.gmra.mrb[8].mxu1 %vm189_vm1, %v462_v29 }
  0x27   : >> { %866 = vmatpush3.bf16.msra.mxu0 %v523_v34  ;;  %867 = vmatprep.mubr.msk.bf16.mxu0 %vm922_vm2, %v921_v3 }
  0x28   : >> { %872 = vmatpush3.bf16.msra.mxu1 %v572_v35  ;;  %877 = vmatprep.subr.bf16.mxu0 %v921_v3 }
  0x29   : >> { %873 = vmatprep.mubr.msk.bf16.mxu1 %vm922_vm2, %v921_v3 }
  0x2e   : >> { %868 = vmatmul.mubr.msk.bf16.vlgmr.msra.gmra.mrb[12].mxu0 %vm189_vm1, %v792_v32  ;;  %874 = vmatmul.mubr.msk.bf16.vlgmr.msra.gmra.mrb[12].mxu1 %vm189_vm1, %v794_v39 }
  0x2f   : >> { %878 = vmatpush3.bf16.msra.mxu0 %v633_v40  ;;  %879 = vmatprep.mubr.msk.bf16.mxu0 %vm922_vm2, %v921_v3 }
  0x36   : >> { %880 = vmatmul.mubr.msk.bf16.vlgmr.msra.gmra.mrb[16].mxu0 %vm189_vm1, %v628_v43 }
  0xe9   : >> { %v231_v44 = vpop.f32.mrb[0].mxu0  ;;  %v277_v45 = vpop.f32.mrb[0].mxu1 }
  0xea   : >> { %v833_v46 = vpop.f32.mrb[1].mxu0  ;;  %v278_v47 = vadd.f32 %v277_v45, %v231_v44  ;;  %v839_v48 = vpop.f32.mrb[1].mxu1 }
  0xeb   : >> { %v234_v49 = vpop.f32.mrb[2].mxu0  ;;  %v280_v50 = vpop.f32.mrb[2].mxu1 }
  0xec   : >> { %v834_v51 = vpop.f32.mrb[3].mxu0  ;;  %v840_v52 = vpop.f32.mrb[3].mxu1 }
  0xf1   : >> { %v337_v53 = vpop.f32.mrb[4].mxu0  ;;  %v393_v54 = vpop.f32.mrb[4].mxu1 }
  0xf2   : >> { %v343_v55 = vadd.f32 %v337_v53, %v278_v47  ;;  %v845_v56 = vpop.f32.mrb[5].mxu0  ;;  %v851_v57 = vpop.f32.mrb[5].mxu1 }
  0xf3   : >> { %v340_v58 = vpop.f32.mrb[6].mxu0  ;;  %v396_v59 = vpop.f32.mrb[6].mxu1 }
  0xf4   : >> { %v399_v60 = vadd.f32 %v393_v54, %v343_v55  ;;  %v846_v61 = vpop.f32.mrb[7].mxu0  ;;  %v852_v62 = vpop.f32.mrb[7].mxu1 }
  0xf9   : >> { %v442_v63 = vpop.f32.mrb[8].mxu0  ;;  %v503_v1 = vpop.f32.mrb[8].mxu1 }
  0xfa   : >> { %v448_v2 = vadd.f32 %v442_v63, %v399_v60  ;;  %v857_v3 = vpop.f32.mrb[9].mxu0  ;;  %v863_v4 = vpop.f32.mrb[9].mxu1 }
  0xfb   : >> { %v445_v5 = vpop.f32.mrb[10].mxu0  ;;  %v506_v6 = vpop.f32.mrb[10].mxu1 }
  0xfc   : >> { %v509_v7 = vadd.f32 %v503_v1, %v448_v2  ;;  %v858_v8 = vpop.f32.mrb[11].mxu0  ;;  %v864_v9 = vpop.f32.mrb[11].mxu1 }
 0x101   : >> { %v559_v10 = vpop.f32.mrb[12].mxu0  ;;  %v608_v11 = vpop.f32.mrb[12].mxu1 }
 0x102   : >> { %v565_v12 = vadd.f32 %v559_v10, %v509_v7  ;;  %v869_v13 = vpop.f32.mrb[13].mxu0  ;;  %v875_v14 = vpop.f32.mrb[13].mxu1 }
 0x103   : >> { %v562_v15 = vpop.f32.mrb[14].mxu0  ;;  %v611_v16 = vpop.f32.mrb[14].mxu1 }
 0x104   : >> { %v614_v17 = vadd.f32 %v608_v11, %v565_v12  ;;  %v870_v18 = vpop.f32.mrb[15].mxu0  ;;  %v876_v19 = vpop.f32.mrb[15].mxu1 }
 0x109   : >> { %v669_v20 = vpop.f32.mrb[16].mxu0 }
 0x10a   : >> { %v675_v21 = vadd.f32 %v669_v20, %v614_v17  ;;  %v881_v22 = vpop.f32.mrb[17].mxu0 }
 0x10b   : >> { %v672_v23 = vpop.f32.mrb[18].mxu0 }
 0x10c   : >> { %v682_v24 = vadd.f32 %v954_v0, %v675_v21  ;;  %v882_v25 = vpop.f32.mrb[19].mxu0  ;;  %177 = sbr.rel (!%p175_p4) target bundleno = 17 (0x11), region = 81 }
 0x10e   : >> { %v683_v26 = vmax.f32 %v682_v24, 0.0 }
 0x110   : >> { %v684_v27 = vpack.c.bf16 %v683_v26, %v683_v26 }
 0x112   : >> { %688 = vst.msk [vmem:[%s686_s21] sm:$0xf] %vm687_vm3, %v684_v27 }
 0x113 PF: > { %s13_s12 = sadd.s32 1, %s915_s12  }
 0x114   : > { %p10_p5 = scmp.ge.s32.totalorder %s13_s12, 4  }
 0x116   :  { %12 = sbr.rel (!%p10_p5) target bundleno = 1 (0x1), region = 92 }

// kernel: vicreg_encoder_forward.7
= control target key start
LH: loop header
LB: loop body
LE: loop exit
PB: predicated region body
PF: predicated region fallthrough
CT: control target
= control target key end

     0   :  { %s1394_s12 = smov 0   ;;  %s1617_s0 = inlined_call_operand.vmem [shape: bf16[2,6,2,3,64], index: 0, kind: input, shape index: {}]   ;;  %s1618_s1 = inlined_call_operand.vmem [shape: bf16[9,64,64], index: 1, kind: input, shape index: {}]   ;;  %s1619_s2 = inlined_call_operand.vmem [shape: f32[1,64], index: 2, kind: input, shape index: {}]   ;;  %s1620_s3 = inlined_call_operand.vmem [shape: bf16[2,2,2,64], index: 3, kind: output, shape index: {}]  }
   0x1 LB: > { %s1012_s13 = sadd.s32 4294967295, %s1365_s12   ;;  %p1016_p0 = scmp.ge.s32.totalorder %s1365_s12, 1  ;;  %s1365_s12 = sphi %s1394_s12, %s13_s12  }
   0x2   : > { %p137_p1 = scmp.lt.s32.totalorder %s1365_s12, 3 }
   0x4   : > { %p138_p2 = pnand %p1016_p0, %p137_p1 }
   0x5   : > { %p160_p3 = scmp.lt.s32.totalorder (!%p138_p2), %s1012_s13, 1  ;;  %v1405_v0 = vld [vmem:[%s1619_s2] ss:$0 sm:$0xff] (!%p138_p2)  ;;  %s1417_s24 = smov (!%p138_p2), 0  }
   0x6   : > { %141 = sbr.rel (%p138_p2) target bundleno = 319 (0x13f), region = 32 }
   0xd   : > { %s1622_s13 = smov (!%p160_p3, %s1012_s13), 1 }
   0xe   : > { %s1299_s16 = smul.u32 24, %s1622_s13  ;;  %s1018_s17 = sshll.u32 %s1622_s13, 1 }
   0xf   : > { %s1410_s20 = scalar_lea.vmem %s1620_s3, %s1018_s17 }
  0x10   : > { %s1415_s23 = scalar_lea.vmem %s1617_s0, %s1299_s16 }
  0x11 LB: >> { %v1319_v1 = vld [vmem:[%s1618_s1 + $0x20] sm:$0xff]   ;;  %v1371_v2 = vmov 0.0   ;;  %v1321_v4 = vld [vmem:[%s1618_s1 + $0x28] sm:$0xff]   ;;  %vm1372_vm0 = vmmov 0   ;;  %v348_v6 = vlaneseq  ;;  %v1323_v7 = vld [vmem:[%s1618_s1 + $0x30] sm:$0xff]   ;;  %s1143_s8 = sshll.u32 %s1369_s24, 3  ;;  %s940_s4 = scalar_lea.vmem %s1410_s20, %s1369_s24  ;;  %s1369_s24 = sphi %s1417_s24, %s176_s24  }
  0x12   : >> { %1191 = vmatprep.subr.bf16.mxu0 %v1371_v2  ;;  %1203 = vmatprep.subr.bf16.mxu1 %v1371_v2  ;;  %v1320_v3 = vld [vmem:[%s1618_s1] sm:$0xff]   ;;  %v1322_v5 = vld [vmem:[%s1618_s1 + $0x8] sm:$0xff]   ;;  %v1324_v8 = vld [vmem:[%s1618_s1 + $0x10] sm:$0xff]   ;;  %s1452_s11 = scalar_lea.vmem %s1415_s23, %s1143_s8  ;;  %v1373_v9 = vmov 1983009808   ;;  %vm224_vm1 = vcmask 523264  }
  0x13   : >> { %1192 = vmatpush3.bf16.msra.mxu0 %v1319_v1  ;;  %1199 = vmatprep.mubr.msk.bf16.mxu0 %vm1372_vm0, %v1371_v2  ;;  %v346_v10 = vunpack.c.l.s4 %v1373_v9  ;;  %v349_v11 = vshrl.u32 %v348_v6, 7  ;;  %v1325_v12 = vld [vmem:[%s1618_s1 + $0x38] sm:$0xff]   ;;  %v182_v15 = vld [vmem:[%s1452_s11 + $0x2] sm:$0x3]  ;;  %v181_v16 = vld [vmem:[%s1452_s11] sm:$0x3] }
  0x14   : >> { %1204 = vmatpush3.bf16.msra.mxu1 %v1320_v3  ;;  %1193 = vmatprep.subr.bf16.mxu0 %v1371_v2  ;;  %v1326_v13 = vld [vmem:[%s1618_s1 + $0x18] sm:$0xff]   ;;  %v1327_v18 = vld [vmem:[%s1618_s1 + $0x40] sm:$0xff]   ;;  %v1329_v21 = vld [vmem:[%s1618_s1 + $0x48] sm:$0xff]   ;;  %vm941_vm2 = vcmask 516096   ;;  %s176_s24 = sadd.s32 1, %s1369_s24  }
  0x15   : >> { %1205 = vmatprep.subr.bf16.mxu1 %v1371_v2  ;;  %1211 = vmatprep.mubr.msk.bf16.mxu1 %vm1372_vm0, %v1371_v2  ;;  %v347_v14 = vunpack.c.0.s8 %v346_v10  ;;  %v1328_v19 = vld [vmem:[%s1618_s1 + $0x60] sm:$0xff]   ;;  %v1330_v22 = vld [vmem:[%s1618_s1 + $0x68] sm:$0xff]   ;;  %v1331_v24 = vld [vmem:[%s1618_s1 + $0x50] sm:$0xff]   ;;  %p173_p4 = scmp.ge.s32.totalorder %s176_s24, 2  }
  0x16   : >> { %v1332_v25 = vld [vmem:[%s1618_s1 + $0x70] sm:$0xff]   ;;  %v1333_v28 = vld [vmem:[%s1618_s1 + $0x58] sm:$0xff]   ;;  %v1335_v31 = vld [vmem:[%s1618_s1 + $0x80] sm:$0xff]  }
  0x17   : >> { %1194 = vmatpush3.bf16.msra.mxu0 %v1321_v4  ;;  %v1464_v17 = vsub.s32 %v347_v14, %v349_v11  ;;  %v1334_v29 = vld [vmem:[%s1618_s1 + $0x78] sm:$0xff]   ;;  %v1055_v32 = vld [vmem:[%s1452_s11 + $0x4] sm:$0x3]  ;;  %v1337_v35 = vld [vmem:[%s1618_s1 + $0x88] sm:$0xff]  }
  0x18   : >> { %1206 = vmatpush3.bf16.msra.mxu1 %v1322_v5  ;;  %1195 = vmatprep.subr.bf16.mxu0 %v1371_v2  ;;  %v1336_v33 = vld [vmem:[%s1618_s1 + $0xa0] sm:$0xff]   ;;  %v1338_v36 = vld [vmem:[%s1618_s1 + $0xa8] sm:$0xff]   ;;  %v1339_v38 = vld [vmem:[%s1618_s1 + $0x90] sm:$0xff]  }
  0x19   : >> { %1207 = vmatprep.subr.bf16.mxu1 %v1371_v2  ;;  %v351_v20 = vrot.slane %v181_v16, %v1464_v17  ;;  %v603_v34 = vrot.slane %v1055_v32, %v1464_v17  ;;  %v1340_v39 = vld [vmem:[%s1618_s1 + $0xb0] sm:$0xff]   ;;  %v1341_v42 = vld [vmem:[%s1618_s1 + $0x98] sm:$0xff]   ;;  %v1056_v45 = vld [vmem:[%s1452_s11 + $0x6] sm:$0x3] }
  0x1a   : >> { %v1342_v43 = vld [vmem:[%s1618_s1 + $0xb8] sm:$0xff]   ;;  %v1343_v46 = vld [vmem:[%s1618_s1 + $0xc0] sm:$0xff]   ;;  %v1345_v48 = vld [vmem:[%s1618_s1 + $0xc8] sm:$0xff]  }
  0x1b   : >> { %1196 = vmatpush3.bf16.msra.mxu0 %v1323_v7  ;;  %v355_v23 = vshll.u32 %v351_v20, 16  ;;  %v353_v26 = vshrl.u32 %v351_v20, 16  ;;  %v607_v37 = vshll.u32 %v603_v34, 16  ;;  %v605_v40 = vshrl.u32 %v603_v34, 16  ;;  %v1344_v47 = vld [vmem:[%s1618_s1 + $0xe0] sm:$0xff]   ;;  %v1346_v49 = vld [vmem:[%s1618_s1 + $0xe8] sm:$0xff]  }
  0x1c   : >> { %1208 = vmatpush3.bf16.msra.mxu1 %v1324_v8  ;;  %1197 = vmatprep.subr.bf16.mxu0 %v1371_v2  ;;  %v1347_v50 = vld [vmem:[%s1618_s1 + $0xd0] sm:$0xff]   ;;  %v1349_v52 = vld [vmem:[%s1618_s1 + $0xd8] sm:$0xff]   ;;  %v1098_v54 = vld [vmem:[%s1452_s11 + $0x8] sm:$0x3] }
  0x1d   : >> { %1209 = vmatprep.subr.bf16.mxu1 %v1371_v2  ;;  %v357_v27 = vrot.slane %v355_v23, 1  ;;  %v609_v41 = vrot.slane %v607_v37, 1  ;;  %v1348_v51 = vld [vmem:[%s1618_s1 + $0xf0] sm:$0xff]   ;;  %v1350_v53 = vld [vmem:[%s1618_s1 + $0xf8] sm:$0xff]   ;;  %v1351_v55 = vld [vmem:[%s1618_s1 + $0x100] sm:$0xff]   ;;  %v855_v57 = vrot.slane %v1098_v54, %v1464_v17 }
  0x1e   : >> { %v1099_v56 = vld [vmem:[%s1452_s11 + $0xa] sm:$0x3]  ;;  %v1353_v60 = vld [vmem:[%s1618_s1 + $0x110] sm:$0xff]   ;;  %v1354_v63 = vld [vmem:[%s1618_s1 + $0x118] sm:$0xff]  }
  0x1f   : >> { %1198 = vmatpush3.bf16.msra.mxu0 %v1325_v12  ;;  %v358_v30 = vor.u32 %v357_v27, %v353_v26  ;;  %v610_v44 = vor.u32 %v609_v41, %v605_v40  ;;  %v1352_v58 = vld [vmem:[%s1618_s1 + $0x108] sm:$0xff]   ;;  %v859_v59 = vshll.u32 %v855_v57, 16  ;;  %v857_v61 = vshrl.u32 %v855_v57, 16 }
  0x20   : >> { %1210 = vmatpush3.bf16.msra.mxu1 %v1326_v13  ;;  %1215 = vmatprep.subr.bf16.mxu0 %v1371_v2 }
  0x21   : >> { %1227 = vmatprep.subr.bf16.mxu1 %v1371_v2  ;;  %v861_v62 = vrot.slane %v859_v59, 1 }
  0x22   : >> { %1200 = vmatmul.mubr.msk.bf16.vlgmr.msra.gmra.mrb[0].mxu0 %vm224_vm1, %v182_v15 }
  0x23   : >> { %1212 = vmatmul.mubr.msk.bf16.vlgmr.msra.gmra.mrb[0].mxu1 %vm224_vm1, %v181_v16  ;;  %1216 = vmatpush3.bf16.msra.mxu0 %v1327_v18  ;;  %v862_v1 = vor.u32 %v861_v62, %v857_v61 }
  0x24   : >> { %1228 = vmatpush3.bf16.msra.mxu1 %v1328_v19  ;;  %1217 = vmatprep.subr.bf16.mxu0 %v1371_v2 }
  0x25   : >> { %1229 = vmatprep.subr.bf16.mxu1 %v1371_v2  ;;  %1223 = vmatprep.mubr.msk.bf16.mxu0 %vm1372_vm0, %v1371_v2 }
  0x26   : >> { %1235 = vmatprep.mubr.msk.bf16.mxu1 %vm1372_vm0, %v1371_v2 }
  0x27   : >> { %1218 = vmatpush3.bf16.msra.mxu0 %v1329_v21 }
  0x28   : >> { %1230 = vmatpush3.bf16.msra.mxu1 %v1330_v22  ;;  %1219 = vmatprep.subr.bf16.mxu0 %v1371_v2 }
  0x29   : >> { %1231 = vmatprep.subr.bf16.mxu1 %v1371_v2 }
  0x2b   : >> { %1220 = vmatpush3.bf16.msra.mxu0 %v1331_v24 }
  0x2c   : >> { %1232 = vmatpush3.bf16.msra.mxu1 %v1332_v25  ;;  %1221 = vmatprep.subr.bf16.mxu0 %v1371_v2 }
  0x2d   : >> { %1233 = vmatprep.subr.bf16.mxu1 %v1371_v2 }
  0x2f   : >> { %1222 = vmatpush3.bf16.msra.mxu0 %v1333_v28 }
  0x30   : >> { %1234 = vmatpush3.bf16.msra.mxu1 %v1334_v29  ;;  %1239 = vmatprep.subr.bf16.mxu0 %v1371_v2 }
  0x31   : >> { %1251 = vmatprep.subr.bf16.mxu1 %v1371_v2 }
  0x32   : >> { %1224 = vmatmul.mubr.msk.bf16.vlgmr.msra.gmra.mrb[4].mxu0 %vm224_vm1, %v358_v30 }
  0x33   : >> { %1240 = vmatpush3.bf16.msra.mxu0 %v1335_v31  ;;  %1236 = vmatmul.mubr.msk.bf16.vlgmr.msra.gmra.mrb[4].mxu1 %vm224_vm1, %v1055_v32 }
  0x34   : >> { %1252 = vmatpush3.bf16.msra.mxu1 %v1336_v33  ;;  %1241 = vmatprep.subr.bf16.mxu0 %v1371_v2 }
  0x35   : >> { %1253 = vmatprep.subr.bf16.mxu1 %v1371_v2  ;;  %1247 = vmatprep.mubr.msk.bf16.mxu0 %vm1372_vm0, %v1371_v2 }
  0x36   : >> { %1259 = vmatprep.mubr.msk.bf16.mxu1 %vm1372_vm0, %v1371_v2 }
  0x37   : >> { %1242 = vmatpush3.bf16.msra.mxu0 %v1337_v35 }
  0x38   : >> { %1254 = vmatpush3.bf16.msra.mxu1 %v1338_v36  ;;  %1243 = vmatprep.subr.bf16.mxu0 %v1371_v2 }
  0x39   : >> { %1255 = vmatprep.subr.bf16.mxu1 %v1371_v2 }
  0x3b   : >> { %1244 = vmatpush3.bf16.msra.mxu0 %v1339_v38 }
  0x3c   : >> { %1256 = vmatpush3.bf16.msra.mxu1 %v1340_v39  ;;  %1245 = vmatprep.subr.bf16.mxu0 %v1371_v2 }
  0x3d   : >> { %1257 = vmatprep.subr.bf16.mxu1 %v1371_v2 }
  0x3f   : >> { %1246 = vmatpush3.bf16.msra.mxu0 %v1341_v42 }
  0x40   : >> { %1258 = vmatpush3.bf16.msra.mxu1 %v1342_v43  ;;  %1263 = vmatprep.subr.bf16.mxu0 %v1371_v2 }
  0x41   : >> { %1275 = vmatprep.subr.bf16.mxu1 %v1371_v2 }
  0x42   : >> { %1248 = vmatmul.mubr.msk.bf16.vlgmr.msra.gmra.mrb[8].mxu0 %vm224_vm1, %v1056_v45 }
  0x43   : >> { %1264 = vmatpush3.bf16.msra.mxu0 %v1343_v46  ;;  %1260 = vmatmul.mubr.msk.bf16.vlgmr.msra.gmra.mrb[8].mxu1 %vm224_vm1, %v610_v44 }
  0x44   : >> { %1276 = vmatpush3.bf16.msra.mxu1 %v1344_v47  ;;  %1265 = vmatprep.subr.bf16.mxu0 %v1371_v2 }
  0x45   : >> { %1277 = vmatprep.subr.bf16.mxu1 %v1371_v2  ;;  %1271 = vmatprep.mubr.msk.bf16.mxu0 %vm1372_vm0, %v1371_v2 }
  0x46   : >> { %1283 = vmatprep.mubr.msk.bf16.mxu1 %vm1372_vm0, %v1371_v2 }
  0x47   : >> { %1266 = vmatpush3.bf16.msra.mxu0 %v1345_v48 }
  0x48   : >> { %1278 = vmatpush3.bf16.msra.mxu1 %v1346_v49  ;;  %1267 = vmatprep.subr.bf16.mxu0 %v1371_v2 }
  0x49   : >> { %1279 = vmatprep.subr.bf16.mxu1 %v1371_v2 }
  0x4b   : >> { %1268 = vmatpush3.bf16.msra.mxu0 %v1347_v50 }
  0x4c   : >> { %1280 = vmatpush3.bf16.msra.mxu1 %v1348_v51  ;;  %1269 = vmatprep.subr.bf16.mxu0 %v1371_v2 }
  0x4d   : >> { %1281 = vmatprep.subr.bf16.mxu1 %v1371_v2 }
  0x4f   : >> { %1270 = vmatpush3.bf16.msra.mxu0 %v1349_v52 }
  0x50   : >> { %1282 = vmatpush3.bf16.msra.mxu1 %v1350_v53  ;;  %1287 = vmatprep.subr.bf16.mxu0 %v1371_v2 }
  0x52   : >> { %1272 = vmatmul.mubr.msk.bf16.vlgmr.msra.gmra.mrb[12].mxu0 %vm224_vm1, %v1098_v54 }
  0x53   : >> { %1288 = vmatpush3.bf16.msra.mxu0 %v1351_v55  ;;  %1284 = vmatmul.mubr.msk.bf16.vlgmr.msra.gmra.mrb[12].mxu1 %vm224_vm1, %v1099_v56 }
  0x54   : >> { %1289 = vmatprep.subr.bf16.mxu0 %v1371_v2  ;;  %1295 = vmatprep.mubr.msk.bf16.mxu0 %vm1372_vm0, %v1371_v2 }
  0x57   : >> { %1290 = vmatpush3.bf16.msra.mxu0 %v1352_v58 }
  0x58   : >> { %1291 = vmatprep.subr.bf16.mxu0 %v1371_v2 }
  0x5b   : >> { %1292 = vmatpush3.bf16.msra.mxu0 %v1353_v60 }
  0x5c   : >> { %1293 = vmatprep.subr.bf16.mxu0 %v1371_v2 }
  0x5f   : >> { %1294 = vmatpush3.bf16.msra.mxu0 %v1354_v63 }
  0x62   : >> { %1296 = vmatmul.mubr.msk.bf16.vlgmr.msra.gmra.mrb[16].mxu0 %vm224_vm1, %v862_v1 }
  0xf5   : >> { %v262_v3 = vpop.f32.mrb[0].mxu0 }
  0xf6   : >> { %v1201_v4 = vpop.f32.mrb[1].mxu0  ;;  %v329_v5 = vpop.f32.mrb[0].mxu1 }
  0xf7   : >> { %v330_v6 = vadd.f32 %v329_v5, %v262_v3  ;;  %v265_v7 = vpop.f32.mrb[2].mxu0  ;;  %v1213_v8 = vpop.f32.mrb[1].mxu1 }
  0xf8   : >> { %v1202_v9 = vpop.f32.mrb[3].mxu0  ;;  %v332_v10 = vpop.f32.mrb[2].mxu1 }
  0xf9   : >> { %v1214_v11 = vpop.f32.mrb[3].mxu1 }
 0x105   : >> { %v420_v12 = vpop.f32.mrb[4].mxu0 }
 0x106   : >> { %v426_v13 = vadd.f32 %v420_v12, %v330_v6  ;;  %v1225_v14 = vpop.f32.mrb[5].mxu0  ;;  %v503_v15 = vpop.f32.mrb[4].mxu1 }
 0x107   : >> { %v423_v16 = vpop.f32.mrb[6].mxu0  ;;  %v1237_v17 = vpop.f32.mrb[5].mxu1 }
 0x108   : >> { %v509_v2 = vadd.f32 %v503_v15, %v426_v13  ;;  %v1226_v18 = vpop.f32.mrb[7].mxu0  ;;  %v506_v19 = vpop.f32.mrb[6].mxu1 }
 0x109   : >> { %v1238_v20 = vpop.f32.mrb[7].mxu1 }
 0x115   : >> { %v580_v21 = vpop.f32.mrb[8].mxu0 }
 0x116   : >> { %v586_v22 = vadd.f32 %v580_v21, %v509_v2  ;;  %v1249_v23 = vpop.f32.mrb[9].mxu0  ;;  %v672_v24 = vpop.f32.mrb[8].mxu1 }
 0x117   : >> { %v583_v25 = vpop.f32.mrb[10].mxu0  ;;  %v1261_v26 = vpop.f32.mrb[9].mxu1 }
 0x118   : >> { %v678_v27 = vadd.f32 %v672_v24, %v586_v22  ;;  %v1250_v28 = vpop.f32.mrb[11].mxu0  ;;  %v675_v29 = vpop.f32.mrb[10].mxu1 }
 0x119   : >> { %v1262_v30 = vpop.f32.mrb[11].mxu1 }
 0x125   : >> { %v755_v31 = vpop.f32.mrb[12].mxu0 }
 0x126   : >> { %v761_v32 = vadd.f32 %v755_v31, %v678_v27  ;;  %v1273_v33 = vpop.f32.mrb[13].mxu0  ;;  %v832_v34 = vpop.f32.mrb[12].mxu1 }
 0x127   : >> { %v758_v35 = vpop.f32.mrb[14].mxu0  ;;  %v1285_v36 = vpop.f32.mrb[13].mxu1 }
 0x128   : >> { %v838_v37 = vadd.f32 %v832_v34, %v761_v32  ;;  %v1274_v38 = vpop.f32.mrb[15].mxu0  ;;  %v835_v39 = vpop.f32.mrb[14].mxu1 }
 0x129   : >> { %v1286_v40 = vpop.f32.mrb[15].mxu1 }
 0x135   : >> { %v924_v41 = vpop.f32.mrb[16].mxu0 }
 0x136   : >> { %v930_v42 = vadd.f32 %v924_v41, %v838_v37  ;;  %v1297_v43 = vpop.f32.mrb[17].mxu0 }
 0x137   : >> { %v927_v44 = vpop.f32.mrb[18].mxu0 }
 0x138   : >> { %v937_v45 = vadd.f32 %v1405_v0, %v930_v42  ;;  %v1298_v46 = vpop.f32.mrb[19].mxu0  ;;  %175 = sbr.rel (!%p173_p4) target bundleno = 17 (0x11), region = 81 }
 0x13a   : >> { %v938_v47 = vmax.f32 %v937_v45, 0.0 }
 0x13c   : >> { %v939_v48 = vpack.c.bf16 %v938_v47, %v938_v47 }
 0x13e   : >> { %942 = vst.msk [vmem:[%s940_s4] sm:$0x1] %vm941_vm2, %v939_v48 }
 0x13f PF: > { %s13_s12 = sadd.s32 1, %s1365_s12  }
 0x140   : > { %p10_p5 = scmp.ge.s32.totalorder %s13_s12, 4  }
 0x142   :  { %12 = sbr.rel (!%p10_p5) target bundleno = 1 (0x1), region = 92 }

// kernel: vicreg_encoder_forward.9
= control target key start
LH: loop header
LB: loop body
LE: loop exit
PB: predicated region body
PF: predicated region fallthrough
CT: control target
= control target key end

     0   :  { %vm198_vm0 = vcmask 261120   ;;  %s340_s1 = inlined_call_operand.vmem [shape: bf16[256,32], index: 1, kind: input, shape index: {}]   ;;  %s341_s0 = inlined_call_operand.vmem [shape: bf16[8,256], index: 0, kind: input, shape index: {}]   ;;  %s342_s2 = inlined_call_operand.vmem [shape: f32[1,32], index: 2, kind: input, shape index: {}]   ;;  %s343_s3 = inlined_call_operand.vmem [shape: f32[8,32], index: 3, kind: output, shape index: {}]  }
   0x1   :  { %v245_v0 = vld [vmem:[%s340_s1 + $0x40] sm:$0xff]   ;;  %v247_v2 = vld [vmem:[%s340_s1 + $0x48] sm:$0xff]   ;;  %v249_v4 = vld [vmem:[%s340_s1 + $0x50] sm:$0xff]  }
   0x2   :  { %v246_v1 = vld [vmem:[%s340_s1] sm:$0xff]   ;;  %223 = vmatprep.subr.bf16.mxu0 %v245_v0  ;;  %v248_v3 = vld [vmem:[%s340_s1 + $0x8] sm:$0xff]   ;;  %v250_v5 = vld [vmem:[%s340_s1 + $0x10] sm:$0xff]  }
   0x3   :  { %224 = vmatpush3.bf16.msra.mxu0 %v246_v1  ;;  %v251_v6 = vld [vmem:[%s340_s1 + $0x58] sm:$0xff]   ;;  %v253_v8 = vld [vmem:[%s340_s1 + $0x60] sm:$0xff]   ;;  %v255_v10 = vld [vmem:[%s340_s1 + $0x68] sm:$0xff]  }
   0x4   :  { %225 = vmatprep.subr.bf16.mxu0 %v247_v2  ;;  %v252_v7 = vld [vmem:[%s340_s1 + $0x18] sm:$0xff]   ;;  %v254_v9 = vld [vmem:[%s340_s1 + $0x20] sm:$0xff]   ;;  %v256_v13 = vld [vmem:[%s340_s1 + $0x28] sm:$0xff]  }
   0x5   :  { %v15_v11 = vld [vmem:[%s341_s0] sm:$0xff]  ;;  %v257_v14 = vld [vmem:[%s340_s1 + $0x70] sm:$0xff]   ;;  %v259_v16 = vld [vmem:[%s340_s1 + $0x78] sm:$0xff]  }
   0x6   :  { %v206_v12 = vcombine.high %v15_v11, %v15_v11  ;;  %v258_v15 = vld [vmem:[%s340_s1 + $0x30] sm:$0xff]   ;;  %v260_v17 = vld [vmem:[%s340_s1 + $0x38] sm:$0xff]   ;;  %v205_v18 = vcombine.low %v15_v11, %v15_v11  ;;  %v204_v20 = vld [vmem:[%s342_s2] ss:$0 sm:$0xff] }
   0x7   :  { %226 = vmatpush3.bf16.msra.mxu0 %v248_v3 }
   0x8   :  { %227 = vmatprep.subr.bf16.mxu0 %v249_v4  ;;  %190 = vmatprep.mubr.bf16.mxu0 %v206_v12 }
   0xb   :  { %228 = vmatpush3.bf16.msra.mxu0 %v250_v5 }
   0xc   :  { %229 = vmatprep.subr.bf16.mxu0 %v251_v6 }
   0xf   :  { %230 = vmatpush3.bf16.msra.mxu0 %v252_v7 }
  0x10   :  { %231 = vmatprep.subr.bf16.mxu0 %v253_v8 }
  0x13   :  { %232 = vmatpush3.bf16.msra.mxu0 %v254_v9 }
  0x14   :  { %233 = vmatprep.subr.bf16.mxu0 %v255_v10 }
  0x17   :  { %234 = vmatpush3.bf16.msra.mxu0 %v256_v13 }
  0x18   :  { %235 = vmatprep.subr.bf16.mxu0 %v257_v14 }
  0x1b   :  { %236 = vmatpush3.bf16.msra.mxu0 %v258_v15 }
  0x1c   :  { %237 = vmatprep.subr.bf16.mxu0 %v259_v16 }
  0x1f   :  { %238 = vmatpush3.bf16.msra.mxu0 %v260_v17 }
  0x22   :  { %191 = vmatmul.mubr.bf16.vlgmr.msra.gmra.mrb[0].mxu0 %v205_v18 }
  0xf5   :  { %v239_v19 = vpop.f32.mrb[0].mxu0 }
  0xf6   :  { %v240_v21 = vpop.f32.mrb[1].mxu0 }
  0xf7   :  { %v241_v22 = vadd.f32 %v240_v21, %v239_v19  ;;  %v242_v23 = vpop.f32.mrb[2].mxu0 }
  0xf8   :  { %v243_v24 = vpop.f32.mrb[3].mxu0 }
  0xf9   :  { %v193_v25 = vadd.f32 %v241_v22, %v204_v20 }
  0xfb   :  { %199 = vst.msk [vmem:[%s343_s3] sm:$0xff] %vm198_vm0, %v193_v25 }

// kernel: vicreg_encoder_forward.8
= control target key start
LH: loop header
LB: loop body
LE: loop exit
PB: predicated region body
PF: predicated region fallthrough
CT: control target
= control target key end

     0   :  { %s1379_s12 = smov 0   ;;  %s1599_s0 = inlined_call_operand.vmem [shape: bf16[2,4,1,4,64], index: 0, kind: input, shape index: {}]   ;;  %s1600_s1 = inlined_call_operand.vmem [shape: bf16[9,64,64], index: 1, kind: input, shape index: {}]   ;;  %s1601_s2 = inlined_call_operand.vmem [shape: f32[1,64], index: 2, kind: input, shape index: {}]   ;;  %s1602_s3 = inlined_call_operand.vmem [shape: bf16[2,2,2,64], index: 3, kind: output, shape index: {}]  }
   0x1 LB: > { %s1006_s13 = sadd.s32 4294967295, %s1350_s12   ;;  %p1010_p0 = scmp.ge.s32.totalorder %s1350_s12, 1  ;;  %s1350_s12 = sphi %s1379_s12, %s13_s12  }
   0x2   : > { %p137_p1 = scmp.lt.s32.totalorder %s1350_s12, 3 }
   0x4   : > { %p138_p2 = pnand %p1010_p0, %p137_p1 }
   0x5   : > { %p160_p3 = scmp.lt.s32.totalorder (!%p138_p2), %s1006_s13, 1  ;;  %v1390_v0 = vld [vmem:[%s1601_s2] ss:$0 sm:$0xff] (!%p138_p2)  ;;  %s1402_s24 = smov (!%p138_p2), 0  }
   0x6   : > { %141 = sbr.rel (%p138_p2) target bundleno = 318 (0x13e), region = 32 }
   0xd   : > { %s1604_s13 = smov (!%p160_p3, %s1006_s13), 1 }
   0xe   : > { %s1131_s16 = sshll.u32 %s1604_s13, 3  ;;  %s1013_s17 = sshll.u32 %s1604_s13, 1 }
   0xf   : > { %s1395_s20 = scalar_lea.vmem %s1599_s0, %s1131_s16  ;;  %s1400_s23 = scalar_lea.vmem %s1602_s3, %s1013_s17 }
  0x10 LB: >> { %v1304_v1 = vld [vmem:[%s1600_s1 + $0x20] sm:$0xff]   ;;  %v1356_v2 = vmov 0.0   ;;  %v1306_v4 = vld [vmem:[%s1600_s1 + $0x28] sm:$0xff]   ;;  %vm1357_vm0 = vmmov 0   ;;  %v201_v6 = vlaneseq  ;;  %v1308_v7 = vld [vmem:[%s1600_s1 + $0x30] sm:$0xff]   ;;  %s1014_s8 = sshll.u32 %s1354_s24, 1  ;;  %s936_s4 = scalar_lea.vmem %s1400_s23, %s1354_s24  ;;  %s1354_s24 = sphi %s1402_s24, %s176_s24  }
  0x11   : >> { %1177 = vmatprep.subr.bf16.mxu0 %v1356_v2  ;;  %1189 = vmatprep.subr.bf16.mxu1 %v1356_v2  ;;  %v1305_v3 = vld [vmem:[%s1600_s1] sm:$0xff]   ;;  %v1307_v5 = vld [vmem:[%s1600_s1 + $0x8] sm:$0xff]   ;;  %v1309_v8 = vld [vmem:[%s1600_s1 + $0x10] sm:$0xff]   ;;  %s1437_s11 = scalar_lea.vmem %s1395_s20, %s1014_s8  ;;  %v1358_v9 = vmov 1983009808   ;;  %vm236_vm1 = vcmask 523264  }
  0x12   : >> { %1178 = vmatpush3.bf16.msra.mxu0 %v1304_v1  ;;  %1185 = vmatprep.mubr.msk.bf16.mxu0 %vm1357_vm0, %v1356_v2  ;;  %v199_v10 = vunpack.c.l.s4 %v1358_v9  ;;  %v202_v11 = vshrl.u32 %v201_v6, 7  ;;  %v1310_v12 = vld [vmem:[%s1600_s1 + $0x38] sm:$0xff]   ;;  %v179_v15 = vld [vmem:[%s1437_s11] sm:$0x3]  ;;  %v1315_v22 = vld [vmem:[%s1600_s1 + $0x68] sm:$0xff]   ;;  %vm937_vm2 = vcmask 516096  }
  0x13   : >> { %1190 = vmatpush3.bf16.msra.mxu1 %v1305_v3  ;;  %1179 = vmatprep.subr.bf16.mxu0 %v1356_v2  ;;  %v1311_v13 = vld [vmem:[%s1600_s1 + $0x18] sm:$0xff]   ;;  %v1313_v18 = vld [vmem:[%s1600_s1 + $0x60] sm:$0xff]   ;;  %v1317_v25 = vld [vmem:[%s1600_s1 + $0x70] sm:$0xff]   ;;  %s176_s24 = sadd.s32 1, %s1354_s24  }
  0x14   : >> { %1191 = vmatprep.subr.bf16.mxu1 %v1356_v2  ;;  %1197 = vmatprep.mubr.msk.bf16.mxu1 %vm1357_vm0, %v1356_v2  ;;  %v200_v14 = vunpack.c.0.s8 %v199_v10  ;;  %v1312_v23 = vld [vmem:[%s1600_s1 + $0x40] sm:$0xff]   ;;  %v1314_v26 = vld [vmem:[%s1600_s1 + $0x48] sm:$0xff]   ;;  %v1319_v27 = vld [vmem:[%s1600_s1 + $0x78] sm:$0xff]   ;;  %p173_p4 = scmp.ge.s32.totalorder %s176_s24, 2  }
  0x15   : >> { %v1316_v28 = vld [vmem:[%s1600_s1 + $0x50] sm:$0xff]   ;;  %v1047_v29 = vld [vmem:[%s1437_s11 + $0x2] sm:$0x3]  ;;  %v1318_v31 = vld [vmem:[%s1600_s1 + $0x58] sm:$0xff]  }
  0x16   : >> { %1180 = vmatpush3.bf16.msra.mxu0 %v1306_v4  ;;  %v1448_v16 = vsub.s32 %v200_v14, %v202_v11  ;;  %v1321_v30 = vld [vmem:[%s1600_s1 + $0xa0] sm:$0xff]   ;;  %v1323_v33 = vld [vmem:[%s1600_s1 + $0xa8] sm:$0xff]   ;;  %v1325_v36 = vld [vmem:[%s1600_s1 + $0xb0] sm:$0xff]  }
  0x17   : >> { %1192 = vmatpush3.bf16.msra.mxu1 %v1307_v5  ;;  %1181 = vmatprep.subr.bf16.mxu0 %v1356_v2  ;;  %v1320_v34 = vld [vmem:[%s1600_s1 + $0x80] sm:$0xff]   ;;  %v1322_v37 = vld [vmem:[%s1600_s1 + $0x88] sm:$0xff]   ;;  %v1327_v39 = vld [vmem:[%s1600_s1 + $0xb8] sm:$0xff]  }
  0x18   : >> { %1193 = vmatprep.subr.bf16.mxu1 %v1356_v2  ;;  %v204_v17 = vrot.slane %v179_v15, %v1448_v16  ;;  %v522_v35 = vrot.slane %v1047_v29, %v1448_v16  ;;  %v1324_v40 = vld [vmem:[%s1600_s1 + $0x90] sm:$0xff]   ;;  %v1329_v44 = vld [vmem:[%s1600_s1 + $0xe0] sm:$0xff]   ;;  %v1326_v46 = vld [vmem:[%s1600_s1 + $0x98] sm:$0xff]  }
  0x19   : >> { %v1088_v45 = vld [vmem:[%s1437_s11 + $0x4] sm:$0x3]  ;;  %v1331_v49 = vld [vmem:[%s1600_s1 + $0xe8] sm:$0xff]   ;;  %v1333_v52 = vld [vmem:[%s1600_s1 + $0xf0] sm:$0xff]  }
  0x1a   : >> { %1182 = vmatpush3.bf16.msra.mxu0 %v1308_v7  ;;  %v206_v19 = vshrl.u32 %v204_v17, 16  ;;  %v208_v20 = vshll.u32 %v204_v17, 16  ;;  %v356_v32 = vrot.slane %v204_v17, 1  ;;  %v526_v38 = vshll.u32 %v522_v35, 16  ;;  %v1328_v50 = vld [vmem:[%s1600_s1 + $0xc0] sm:$0xff]   ;;  %v1330_v53 = vld [vmem:[%s1600_s1 + $0xc8] sm:$0xff]  }
  0x1b   : >> { %1194 = vmatpush3.bf16.msra.mxu1 %v1309_v8  ;;  %1183 = vmatprep.subr.bf16.mxu0 %v1356_v2  ;;  %v607_v41 = vrot.slane %v522_v35, 1  ;;  %v524_v42 = vshrl.u32 %v522_v35, 16  ;;  %v773_v47 = vrot.slane %v1088_v45, %v1448_v16  ;;  %v1335_v56 = vld [vmem:[%s1600_s1 + $0xf8] sm:$0xff]   ;;  %v1332_v57 = vld [vmem:[%s1600_s1 + $0xd0] sm:$0xff]   ;;  %v1336_v60 = vld [vmem:[%s1600_s1 + $0x100] sm:$0xff]  }
  0x1c   : >> { %1195 = vmatprep.subr.bf16.mxu1 %v1356_v2  ;;  %v210_v21 = vrot.slane %v208_v20, 1  ;;  %v528_v43 = vrot.slane %v526_v38, 1  ;;  %v1334_v59 = vld [vmem:[%s1600_s1 + $0xd8] sm:$0xff]   ;;  %v1337_v61 = vld [vmem:[%s1600_s1 + $0x108] sm:$0xff]   ;;  %v1338_v62 = vld [vmem:[%s1600_s1 + $0x110] sm:$0xff]  }
  0x1d   : >> { %v777_v51 = vshll.u32 %v773_v47, 16  ;;  %v775_v54 = vshrl.u32 %v773_v47, 16  ;;  %v1339_v63 = vld [vmem:[%s1600_s1 + $0x118] sm:$0xff]   ;;  %v858_v1 = vrot.slane %v773_v47, 1 }
  0x1e   : >> { %1184 = vmatpush3.bf16.msra.mxu0 %v1310_v12  ;;  %v211_v24 = vor.u32 %v210_v21, %v206_v19  ;;  %v529_v48 = vor.u32 %v528_v43, %v524_v42 }
  0x1f   : >> { %1196 = vmatpush3.bf16.msra.mxu1 %v1311_v13  ;;  %1201 = vmatprep.subr.bf16.mxu0 %v1356_v2  ;;  %v779_v55 = vrot.slane %v777_v51, 1 }
  0x20   : >> { %1213 = vmatprep.subr.bf16.mxu1 %v1356_v2 }
  0x21   : >> { %1186 = vmatmul.mubr.msk.bf16.vlgmr.msra.gmra.mrb[0].mxu0 %vm236_vm1, %v211_v24  ;;  %v780_v58 = vor.u32 %v779_v55, %v775_v54 }
  0x22   : >> { %1198 = vmatmul.mubr.msk.bf16.vlgmr.msra.gmra.mrb[0].mxu1 %vm236_vm1, %v179_v15  ;;  %1202 = vmatpush3.bf16.msra.mxu0 %v1312_v23 }
  0x23   : >> { %1214 = vmatpush3.bf16.msra.mxu1 %v1313_v18  ;;  %1221 = vmatprep.mubr.msk.bf16.mxu1 %vm1357_vm0, %v1356_v2 }
  0x24   : >> { %1215 = vmatprep.subr.bf16.mxu1 %v1356_v2  ;;  %1203 = vmatprep.subr.bf16.mxu0 %v1356_v2 }
  0x25   : >> { %1209 = vmatprep.mubr.msk.bf16.mxu0 %vm1357_vm0, %v1356_v2 }
  0x26   : >> { %1204 = vmatpush3.bf16.msra.mxu0 %v1314_v26 }
  0x27   : >> { %1216 = vmatpush3.bf16.msra.mxu1 %v1315_v22  ;;  %1205 = vmatprep.subr.bf16.mxu0 %v1356_v2 }
  0x28   : >> { %1217 = vmatprep.subr.bf16.mxu1 %v1356_v2 }
  0x2a   : >> { %1206 = vmatpush3.bf16.msra.mxu0 %v1316_v28 }
  0x2b   : >> { %1218 = vmatpush3.bf16.msra.mxu1 %v1317_v25  ;;  %1207 = vmatprep.subr.bf16.mxu0 %v1356_v2 }
  0x2c   : >> { %1219 = vmatprep.subr.bf16.mxu1 %v1356_v2 }
  0x2e   : >> { %1208 = vmatpush3.bf16.msra.mxu0 %v1318_v31 }
  0x2f   : >> { %1220 = vmatpush3.bf16.msra.mxu1 %v1319_v27  ;;  %1225 = vmatprep.subr.bf16.mxu0 %v1356_v2 }
  0x30   : >> { %1237 = vmatprep.subr.bf16.mxu1 %v1356_v2 }
  0x31   : >> { %1210 = vmatmul.mubr.msk.bf16.vlgmr.msra.gmra.mrb[4].mxu0 %vm236_vm1, %v356_v32 }
  0x32   : >> { %1222 = vmatmul.mubr.msk.bf16.vlgmr.msra.gmra.mrb[4].mxu1 %vm236_vm1, %v1047_v29  ;;  %1226 = vmatpush3.bf16.msra.mxu0 %v1320_v34 }
  0x33   : >> { %1238 = vmatpush3.bf16.msra.mxu1 %v1321_v30  ;;  %1245 = vmatprep.mubr.msk.bf16.mxu1 %vm1357_vm0, %v1356_v2 }
  0x34   : >> { %1239 = vmatprep.subr.bf16.mxu1 %v1356_v2  ;;  %1227 = vmatprep.subr.bf16.mxu0 %v1356_v2 }
  0x35   : >> { %1233 = vmatprep.mubr.msk.bf16.mxu0 %vm1357_vm0, %v1356_v2 }
  0x36   : >> { %1228 = vmatpush3.bf16.msra.mxu0 %v1322_v37 }
  0x37   : >> { %1240 = vmatpush3.bf16.msra.mxu1 %v1323_v33  ;;  %1229 = vmatprep.subr.bf16.mxu0 %v1356_v2 }
  0x38   : >> { %1241 = vmatprep.subr.bf16.mxu1 %v1356_v2 }
  0x3a   : >> { %1230 = vmatpush3.bf16.msra.mxu0 %v1324_v40 }
  0x3b   : >> { %1242 = vmatpush3.bf16.msra.mxu1 %v1325_v36  ;;  %1231 = vmatprep.subr.bf16.mxu0 %v1356_v2 }
  0x3c   : >> { %1243 = vmatprep.subr.bf16.mxu1 %v1356_v2 }
  0x3e   : >> { %1232 = vmatpush3.bf16.msra.mxu0 %v1326_v46 }
  0x3f   : >> { %1244 = vmatpush3.bf16.msra.mxu1 %v1327_v39  ;;  %1249 = vmatprep.subr.bf16.mxu0 %v1356_v2 }
  0x40   : >> { %1261 = vmatprep.subr.bf16.mxu1 %v1356_v2 }
  0x41   : >> { %1234 = vmatmul.mubr.msk.bf16.vlgmr.msra.gmra.mrb[8].mxu0 %vm236_vm1, %v529_v48 }
  0x42   : >> { %1246 = vmatmul.mubr.msk.bf16.vlgmr.msra.gmra.mrb[8].mxu1 %vm236_vm1, %v607_v41  ;;  %1250 = vmatpush3.bf16.msra.mxu0 %v1328_v50 }
  0x43   : >> { %1262 = vmatpush3.bf16.msra.mxu1 %v1329_v44  ;;  %1269 = vmatprep.mubr.msk.bf16.mxu1 %vm1357_vm0, %v1356_v2 }
  0x44   : >> { %1263 = vmatprep.subr.bf16.mxu1 %v1356_v2  ;;  %1251 = vmatprep.subr.bf16.mxu0 %v1356_v2 }
  0x45   : >> { %1257 = vmatprep.mubr.msk.bf16.mxu0 %vm1357_vm0, %v1356_v2 }
  0x46   : >> { %1252 = vmatpush3.bf16.msra.mxu0 %v1330_v53 }
  0x47   : >> { %1264 = vmatpush3.bf16.msra.mxu1 %v1331_v49  ;;  %1253 = vmatprep.subr.bf16.mxu0 %v1356_v2 }
  0x48   : >> { %1265 = vmatprep.subr.bf16.mxu1 %v1356_v2 }
  0x4a   : >> { %1254 = vmatpush3.bf16.msra.mxu0 %v1332_v57 }
  0x4b   : >> { %1266 = vmatpush3.bf16.msra.mxu1 %v1333_v52  ;;  %1255 = vmatprep.subr.bf16.mxu0 %v1356_v2 }
  0x4c   : >> { %1267 = vmatprep.subr.bf16.mxu1 %v1356_v2 }
  0x4e   : >> { %1256 = vmatpush3.bf16.msra.mxu0 %v1334_v59 }
  0x4f   : >> { %1268 = vmatpush3.bf16.msra.mxu1 %v1335_v56  ;;  %1273 = vmatprep.subr.bf16.mxu0 %v1356_v2 }
  0x51   : >> { %1258 = vmatmul.mubr.msk.bf16.vlgmr.msra.gmra.mrb[12].mxu0 %vm236_vm1, %v1088_v45 }
  0x52   : >> { %1270 = vmatmul.mubr.msk.bf16.vlgmr.msra.gmra.mrb[12].mxu1 %vm236_vm1, %v780_v58  ;;  %1274 = vmatpush3.bf16.msra.mxu0 %v1336_v60 }
  0x53   : >> { %1281 = vmatprep.mubr.msk.bf16.mxu0 %vm1357_vm0, %v1356_v2  ;;  %1275 = vmatprep.subr.bf16.mxu0 %v1356_v2 }
  0x56   : >> { %1276 = vmatpush3.bf16.msra.mxu0 %v1337_v61 }
  0x57   : >> { %1277 = vmatprep.subr.bf16.mxu0 %v1356_v2 }
  0x5a   : >> { %1278 = vmatpush3.bf16.msra.mxu0 %v1338_v62 }
  0x5b   : >> { %1279 = vmatprep.subr.bf16.mxu0 %v1356_v2 }
  0x5e   : >> { %1280 = vmatpush3.bf16.msra.mxu0 %v1339_v63 }
  0x61   : >> { %1282 = vmatmul.mubr.msk.bf16.vlgmr.msra.gmra.mrb[16].mxu0 %vm236_vm1, %v858_v1 }
  0xf4   : >> { %v274_v7 = vpop.f32.mrb[0].mxu0 }
  0xf5   : >> { %v341_v3 = vpop.f32.mrb[0].mxu1  ;;  %v1187_v8 = vpop.f32.mrb[1].mxu0 }
  0xf6   : >> { %v1199_v4 = vpop.f32.mrb[1].mxu1  ;;  %v342_v9 = vadd.f32 %v341_v3, %v274_v7  ;;  %v277_v10 = vpop.f32.mrb[2].mxu0 }
  0xf7   : >> { %v344_v5 = vpop.f32.mrb[2].mxu1  ;;  %v1188_v11 = vpop.f32.mrb[3].mxu0 }
  0xf8   : >> { %v1200_v6 = vpop.f32.mrb[3].mxu1 }
 0x104   : >> { %v418_v16 = vpop.f32.mrb[4].mxu0 }
 0x105   : >> { %v499_v12 = vpop.f32.mrb[4].mxu1  ;;  %v424_v17 = vadd.f32 %v418_v16, %v342_v9  ;;  %v1211_v2 = vpop.f32.mrb[5].mxu0 }
 0x106   : >> { %v1223_v13 = vpop.f32.mrb[5].mxu1  ;;  %v421_v18 = vpop.f32.mrb[6].mxu0 }
 0x107   : >> { %v502_v14 = vpop.f32.mrb[6].mxu1  ;;  %v505_v19 = vadd.f32 %v499_v12, %v424_v17  ;;  %v1212_v20 = vpop.f32.mrb[7].mxu0 }
 0x108   : >> { %v1224_v15 = vpop.f32.mrb[7].mxu1 }
 0x114   : >> { %v591_v25 = vpop.f32.mrb[8].mxu0 }
 0x115   : >> { %v669_v21 = vpop.f32.mrb[8].mxu1  ;;  %v597_v26 = vadd.f32 %v591_v25, %v505_v19  ;;  %v1235_v27 = vpop.f32.mrb[9].mxu0 }
 0x116   : >> { %v1247_v22 = vpop.f32.mrb[9].mxu1  ;;  %v594_v28 = vpop.f32.mrb[10].mxu0 }
 0x117   : >> { %v672_v23 = vpop.f32.mrb[10].mxu1  ;;  %v675_v29 = vadd.f32 %v669_v21, %v597_v26  ;;  %v1236_v30 = vpop.f32.mrb[11].mxu0 }
 0x118   : >> { %v1248_v24 = vpop.f32.mrb[11].mxu1 }
 0x124   : >> { %v750_v35 = vpop.f32.mrb[12].mxu0 }
 0x125   : >> { %v842_v31 = vpop.f32.mrb[12].mxu1  ;;  %v756_v36 = vadd.f32 %v750_v35, %v675_v29  ;;  %v1259_v37 = vpop.f32.mrb[13].mxu0 }
 0x126   : >> { %v1271_v32 = vpop.f32.mrb[13].mxu1  ;;  %v753_v38 = vpop.f32.mrb[14].mxu0 }
 0x127   : >> { %v845_v33 = vpop.f32.mrb[14].mxu1  ;;  %v848_v39 = vadd.f32 %v842_v31, %v756_v36  ;;  %v1260_v40 = vpop.f32.mrb[15].mxu0 }
 0x128   : >> { %v1272_v34 = vpop.f32.mrb[15].mxu1 }
 0x134   : >> { %v920_v41 = vpop.f32.mrb[16].mxu0 }
 0x135   : >> { %v926_v42 = vadd.f32 %v920_v41, %v848_v39  ;;  %v1283_v43 = vpop.f32.mrb[17].mxu0 }
 0x136   : >> { %v923_v44 = vpop.f32.mrb[18].mxu0 }
 0x137   : >> { %v933_v45 = vadd.f32 %v1390_v0, %v926_v42  ;;  %v1284_v46 = vpop.f32.mrb[19].mxu0  ;;  %175 = sbr.rel (!%p173_p4) target bundleno = 16 (0x10), region = 81 }
 0x139   : >> { %v934_v47 = vmax.f32 %v933_v45, 0.0 }
 0x13b   : >> { %v935_v48 = vpack.c.bf16 %v934_v47, %v934_v47 }
 0x13d   : >> { %938 = vst.msk [vmem:[%s936_s4] sm:$0x1] %vm937_vm2, %v935_v48 }
 0x13e PF: > { %s13_s12 = sadd.s32 1, %s1350_s12  }
 0x13f   : > { %p10_p5 = scmp.ge.s32.totalorder %s13_s12, 4  }
 0x141   :  { %12 = sbr.rel (!%p10_p5) target bundleno = 1 (0x1), region = 92 }

</bundles_post_ra>
